<compile_context>
chip_gen: v6e
topology: v6e:2x2x1
jax: 0.10.0
libtpu: 0.0.40
codegen_flags: <defaults>
</compile_context>

<pallas_src>
import functools
import math

import jax
import jax.numpy as jnp
from jax import lax
from jax.experimental import pallas as pl
from jax.experimental.pallas import tpu as pltpu

# ---- small, module-consistent shapes -------------------------------------
B = 2           # batch
S = 8           # seq len
D = 32          # d_model
D_FF = 64       # d_ff
H = 4           # n_heads
N_LAYERS = 2    # n_layers
VOCAB = 50
MAX_LEN = 16
LN_EPS = 1e-5   # nn.LayerNorm default eps


def _layer_norm(x, g, b):
    mu = jnp.mean(x, axis=-1, keepdims=True)
    var = jnp.mean((x - mu) ** 2, axis=-1, keepdims=True)
    return (x - mu) * lax.rsqrt(var + LN_EPS) * g + b


# ---------------------------------------------------------------------------
# Single grid-less kernel: whole encoder stack, weights fully VMEM-resident,
# static Python unroll over layers.
# ---------------------------------------------------------------------------
def encoder_stack_kernel(x0_ref, bias_ref,
                         wqkv_ref, bqkv_ref, wo_ref, bo_ref,
                         g1_ref, be1_ref,
                         w1_ref, b1_ref, w2_ref, b2_ref,
                         g2_ref, be2_ref,
                         o_ref, *, n_layers, n_heads, inv_scale, d_model):
    x = x0_ref[...]                     # (B*S, D) activation, carried as a local value
    bias = bias_ref[...]                # (B*S, B*S) additive mask (0 or -1e10)

    d = d_model
    dh = d // n_heads

    for l in range(n_layers):           # static unroll; weights already in VMEM
        # Fused QKV projection: one MXU matmul instead of three.
        qkv = jnp.dot(x, wqkv_ref[l], preferred_element_type=jnp.float32) + bqkv_ref[l]
        q = qkv[:, 0 * d:1 * d] * inv_scale      # fold 1/scale into Q (mul, not div)
        k = qkv[:, 1 * d:2 * d]
        v = qkv[:, 2 * d:3 * d]

        # Per-head attention.  Scores via dot_general contracting last dims of both
        # operands -> no XLU transpose of K anywhere in the loop.
        ctx_parts = []
        for h in range(n_heads):                 # static unroll over heads
            sl = slice(h * dh, (h + 1) * dh)
            s = lax.dot_general(
                q[:, sl], k[:, sl],
                dimension_numbers=(((1,), (1,)), ((), ())),
                preferred_element_type=jnp.float32) + bias
            s = s - jnp.max(s, axis=-1, keepdims=True)       # stable softmax
            p = jnp.exp(s)
            p = p / jnp.sum(p, axis=-1, keepdims=True)       # exact denom (overhead-bound)
            ctx_parts.append(jnp.dot(p, v[:, sl], preferred_element_type=jnp.float32))

        # Merge head outputs (lane concat) and hit fc_o with ONE matmul.
        ctx = jnp.concatenate(ctx_parts, axis=-1)            # (B*S, D)
        attn = jnp.dot(ctx, wo_ref[l], preferred_element_type=jnp.float32) + bo_ref[l]

        # residual + LayerNorm  (dropout = identity in eval mode)
        x1 = _layer_norm(x + attn, g1_ref[l], be1_ref[l])

        # FeedForward: Linear -> ReLU -> (Dropout=id) -> Linear
        h1 = jnp.maximum(
            jnp.dot(x1, w1_ref[l], preferred_element_type=jnp.float32) + b1_ref[l], 0.0)
        ff = jnp.dot(h1, w2_ref[l], preferred_element_type=jnp.float32) + b2_ref[l]

        x = _layer_norm(x1 + ff, g2_ref[l], be2_ref[l])

    o_ref[...] = x
    # NOTE: at real sizes keep D / D_FF multiples of 128 (unmasked vst, full lane occupancy);
    # at this toy D=32 padding is skipped to keep LayerNorm reductions exact over d_model.


def encoder_stack(x0, bias, pk, *, n_heads):
    bs, d = x0.shape
    n_layers = pk["w1"].shape[0]
    inv_scale = 1.0 / math.sqrt(d / n_heads)

    vmem = pl.BlockSpec(memory_space=pltpu.MemorySpace.VMEM)   # whole array, VMEM-resident
    args = (x0, bias,
            pk["wqkv"], pk["bqkv"], pk["wo"], pk["bo"],
            pk["ln1_g"], pk["ln1_b"], pk["w1"], pk["b1"], pk["w2"], pk["b2"],
            pk["ln2_g"], pk["ln2_b"])

    return pl.pallas_call(
        functools.partial(encoder_stack_kernel, n_layers=n_layers, n_heads=n_heads,
                          inv_scale=inv_scale, d_model=d),
        out_shape=jax.ShapeDtypeStruct((bs, d), jnp.float32),
        in_specs=[vmem] * len(args),
        out_specs=vmem,
    )(*args)


# ---------------------------------------------------------------------------
# Wrapper glue: embedding gathers, mask bias, weight stacking (plain JAX)
# ---------------------------------------------------------------------------
def pack_params(params):
    layers = params["layers"]

    def stack(key):
        return jnp.stack([lp[key] for lp in layers])

    return {
        "wqkv": jnp.stack([jnp.concatenate([lp["wq"], lp["wk"], lp["wv"]], axis=1)
                           for lp in layers]),
        "bqkv": jnp.stack([jnp.concatenate([lp["bq"], lp["bk"], lp["bv"]], axis=1)
                           for lp in layers]),
        "wo": stack("wo"), "bo": stack("bo"),
        "ln1_g": stack("ln1_g"), "ln1_b": stack("ln1_b"),
        "w1": stack("w1"), "b1": stack("b1"),
        "w2": stack("w2"), "b2": stack("b2"),
        "ln2_g": stack("ln2_g"), "ln2_b": stack("ln2_b"),
    }


def build_attn_bias(mask, b, s):
    # mask: (B, 1, S) float, 1.0 = padded key position.
    key_pad = (mask[:, 0, :].reshape(b * s) > 0.5)                 # (B*S,)
    batch_id = jnp.repeat(jnp.arange(b), s)                        # (B*S,)
    same_batch = batch_id[:, None] == batch_id[None, :]            # (B*S, B*S)
    valid = jnp.logical_and(same_batch, jnp.logical_not(key_pad)[None, :])
    return jnp.where(valid, 0.0, -1e10).astype(jnp.float32)


def encoder_forward(src, mask, params, *, atten_map_save=False):
    # src: (B, S) int32 token ids; mask: (B, 1, S) float (1.0 = pad)
    b, s = src.shape
    tok_emb = params["tok_table"][src]                         # (B, S, D) gather (glue)
    pos_emb = params["pos_table"][jnp.arange(s)]               # (S, D)
    x0 = (math.sqrt(D) * tok_emb + pos_emb).reshape(b * s, D)  # combine in wrapper (no launch)
    bias = build_attn_bias(mask, b, s)
    pk = pack_params(params)

    x = encoder_stack(x0, bias, pk, n_heads=H).reshape(b, s, D)

    # TODO(synk): atten_map_save=True path (returning per-layer attention maps) not implemented.
    atten_encs = jnp.zeros((0,), jnp.float32)
    return x, atten_encs


# ---------------------------------------------------------------------------
# Deterministic parameter init + pure-JAX reference for verification
# ---------------------------------------------------------------------------
def init_params(key):
    def nrm(k, shape, scl=0.02):
        return (scl * jax.random.normal(k, shape)).astype(jnp.float32)

    keys = iter(jax.random.split(key, 8 + N_LAYERS * 8))
    params = {
        "tok_table": nrm(next(keys), (VOCAB, D), 1.0),
        "pos_table": nrm(next(keys), (MAX_LEN, D), 1.0),
        "layers": [],
    }
    for _ in range(N_LAYERS):
        lp = {
            "wq": nrm(next(keys), (D, D)), "bq": jnp.zeros((1, D), jnp.float32),
            "wk": nrm(next(keys), (D, D)), "bk": jnp.zeros((1, D), jnp.float32),
            "wv": nrm(next(keys), (D, D)), "bv": jnp.zeros((1, D), jnp.float32),
            "wo": nrm(next(keys), (D, D)), "bo": jnp.zeros((1, D), jnp.float32),
            "ln1_g": jnp.ones((1, D), jnp.float32), "ln1_b": jnp.zeros((1, D), jnp.float32),
            "w1": nrm(next(keys), (D, D_FF)), "b1": jnp.zeros((1, D_FF), jnp.float32),
            "w2": nrm(next(keys), (D_FF, D)), "b2": jnp.zeros((1, D), jnp.float32),
            "ln2_g": jnp.ones((1, D), jnp.float32), "ln2_b": jnp.zeros((1, D), jnp.float32),
        }
        params["layers"].append(lp)
    return params


def ref_forward(src, mask, params):
    x = math.sqrt(D) * params["tok_table"][src] + params["pos_table"][jnp.arange(src.shape[1])]
    keymask = (mask[:, :, None, :] > 0.5)  # (B,1,1,S) -> broadcast over heads/queries
    for p in params["layers"]:
        q = (x @ p["wq"] + p["bq"]).reshape(B, S, H, D // H).transpose(0, 2, 1, 3)
        k = (x @ p["wk"] + p["bk"]).reshape(B, S, H, D // H).transpose(0, 2, 1, 3)
        v = (x @ p["wv"] + p["bv"]).reshape(B, S, H, D // H).transpose(0, 2, 1, 3)
        s = (q @ k.transpose(0, 1, 3, 2)) / math.sqrt(D / H)
        s = jnp.where(keymask, -1e10, s)
        w = jax.nn.softmax(s, axis=-1)
        a = (w @ v).transpose(0, 2, 1, 3).reshape(B, S, D)
        a = a @ p["wo"] + p["bo"]
        x = _layer_norm(x + a, p["ln1_g"], p["ln1_b"])
        ff = jnp.maximum(x @ p["w1"] + p["b1"], 0.0) @ p["w2"] + p["b2"]
        x = _layer_norm(x + ff, p["ln2_g"], p["ln2_b"])
    return x


if __name__ == "__main__":
    key = jax.random.PRNGKey(0)
    kp, ks = jax.random.split(key)
    params = init_params(kp)

    src = jax.random.randint(ks, (B, S), 0, VOCAB, dtype=jnp.int32)
    # padding mask: sequence lengths [8, 6] -> positions >= len are padded (True)
    lengths = jnp.array([8, 6], dtype=jnp.int32)
    mask = (jnp.arange(S)[None, :] >= lengths[:, None]).astype(jnp.float32)[:, None, :]  # (B,1,S)

    out, atten_encs = encoder_forward(src, mask, params)
    out = jax.block_until_ready(out)

    ref = ref_forward(src, mask, params)
    assert out.shape == (B, S, D)
    assert bool(jnp.all(jnp.isfinite(out)))
    assert bool(jnp.allclose(out, ref, atol=1e-2, rtol=1e-2)), "mismatch vs JAX reference"

    print("KERNEL_OK")
</pallas_src>

<mosaic_0001>
module attributes {stable_mosaic.version = 11 : i64} {
  func.func @encoder_stack_kernel(%arg0: memref<16x32xf32, #tpu.memory_space<vmem>>, %arg1: memref<16x16xf32, #tpu.memory_space<vmem>>, %arg2: memref<2x32x96xf32, #tpu.memory_space<vmem>>, %arg3: memref<2x1x96xf32, #tpu.memory_space<vmem>>, %arg4: memref<2x32x32xf32, #tpu.memory_space<vmem>>, %arg5: memref<2x1x32xf32, #tpu.memory_space<vmem>>, %arg6: memref<2x1x32xf32, #tpu.memory_space<vmem>>, %arg7: memref<2x1x32xf32, #tpu.memory_space<vmem>>, %arg8: memref<2x32x64xf32, #tpu.memory_space<vmem>>, %arg9: memref<2x1x64xf32, #tpu.memory_space<vmem>>, %arg10: memref<2x64x32xf32, #tpu.memory_space<vmem>>, %arg11: memref<2x1x32xf32, #tpu.memory_space<vmem>>, %arg12: memref<2x1x32xf32, #tpu.memory_space<vmem>>, %arg13: memref<2x1x32xf32, #tpu.memory_space<vmem>>, %arg14: memref<16x32xf32, #tpu.memory_space<vmem>>) attributes {dimension_semantics = [], scalar_prefetch = 0 : i64, scratch_operands = 0 : i64, tpu.core_type = #tpu.core_type<tc>} {
    %c0 = arith.constant 0 : index
    %c0_0 = arith.constant 0 : index
    %0 = vector.load %arg0[%c0, %c0_0] : memref<16x32xf32, #tpu.memory_space<vmem>>, vector<16x32xf32>
    %c0_1 = arith.constant 0 : index
    %c0_2 = arith.constant 0 : index
    %1 = vector.load %arg1[%c0_1, %c0_2] : memref<16x16xf32, #tpu.memory_space<vmem>>, vector<16x16xf32>
    %c0_3 = arith.constant 0 : index
    %c0_4 = arith.constant 0 : index
    %c0_5 = arith.constant 0 : index
    %2 = vector.load %arg2[%c0_3, %c0_4, %c0_5] : memref<2x32x96xf32, #tpu.memory_space<vmem>>, vector<1x32x96xf32>
    %3 = vector.shape_cast %2 : vector<1x32x96xf32> to vector<32x96xf32>
    %cst = arith.constant dense<0.000000e+00> : vector<16x96xf32>
    %4 = tpu.matmul %0, %3, %cst {dimension_numbers = #tpu.dot_dimension_numbers<[1], [0], [0], [1], [0, 0, 1, 1], [], []>} : vector<16x32xf32>, vector<32x96xf32>, vector<16x96xf32> -> vector<16x96xf32>
    %c0_6 = arith.constant 0 : index
    %c0_7 = arith.constant 0 : index
    %c0_8 = arith.constant 0 : index
    %5 = vector.load %arg3[%c0_6, %c0_7, %c0_8] : memref<2x1x96xf32, #tpu.memory_space<vmem>>, vector<1x1x96xf32>
    %6 = vector.shape_cast %5 : vector<1x1x96xf32> to vector<1x96xf32>
    %7 = vector.broadcast %6 : vector<1x96xf32> to vector<16x96xf32>
    %8 = arith.addf %4, %7 : vector<16x96xf32>
    %9 = vector.extract_strided_slice %8 {offsets = [0, 0], sizes = [16, 32], strides = [1, 1]} : vector<16x96xf32> to vector<16x32xf32>
    %cst_9 = arith.constant 0.353553385 : f32
    %10 = vector.broadcast %cst_9 : f32 to vector<16x32xf32>
    %11 = arith.mulf %9, %10 : vector<16x32xf32>
    %12 = vector.extract_strided_slice %8 {offsets = [0, 32], sizes = [16, 32], strides = [1, 1]} : vector<16x96xf32> to vector<16x32xf32>
    %13 = vector.extract_strided_slice %8 {offsets = [0, 64], sizes = [16, 32], strides = [1, 1]} : vector<16x96xf32> to vector<16x32xf32>
    %14 = vector.extract_strided_slice %11 {offsets = [0, 0], sizes = [16, 8], strides = [1, 1]} : vector<16x32xf32> to vector<16x8xf32>
    %15 = vector.extract_strided_slice %12 {offsets = [0, 0], sizes = [16, 8], strides = [1, 1]} : vector<16x32xf32> to vector<16x8xf32>
    %cst_10 = arith.constant dense<0.000000e+00> : vector<16x16xf32>
    %16 = tpu.matmul %14, %15, %cst_10 {dimension_numbers = #tpu.dot_dimension_numbers<[1], [1], [0], [0], [0, 0, 1, 0], [], []>} : vector<16x8xf32>, vector<16x8xf32>, vector<16x16xf32> -> vector<16x16xf32>
    %17 = arith.addf %16, %1 : vector<16x16xf32>
    %cst_11 = arith.constant dense<0xFF800000> : vector<16xf32>
    %18 = vector.multi_reduction <maximumf>, %17, %cst_11 [1] : vector<16x16xf32> to vector<16xf32>
    %19 = vector.shape_cast %18 : vector<16xf32> to vector<16x1xf32>
    %20 = vector.broadcast %19 : vector<16x1xf32> to vector<16x16xf32>
    %21 = arith.subf %17, %20 : vector<16x16xf32>
    %22 = math.exp %21 : vector<16x16xf32>
    %cst_12 = arith.constant dense<0.000000e+00> : vector<16xf32>
    %23 = vector.multi_reduction <add>, %22, %cst_12 [1] : vector<16x16xf32> to vector<16xf32>
    %24 = vector.shape_cast %23 : vector<16xf32> to vector<16x1xf32>
    %25 = vector.broadcast %24 : vector<16x1xf32> to vector<16x16xf32>
    %26 = arith.divf %22, %25 : vector<16x16xf32>
    %27 = vector.extract_strided_slice %13 {offsets = [0, 0], sizes = [16, 8], strides = [1, 1]} : vector<16x32xf32> to vector<16x8xf32>
    %cst_13 = arith.constant dense<0.000000e+00> : vector<16x8xf32>
    %28 = tpu.matmul %26, %27, %cst_13 {dimension_numbers = #tpu.dot_dimension_numbers<[1], [0], [0], [1], [0, 0, 1, 1], [], []>} : vector<16x16xf32>, vector<16x8xf32>, vector<16x8xf32> -> vector<16x8xf32>
    %29 = vector.extract_strided_slice %11 {offsets = [0, 8], sizes = [16, 8], strides = [1, 1]} : vector<16x32xf32> to vector<16x8xf32>
    %30 = vector.extract_strided_slice %12 {offsets = [0, 8], sizes = [16, 8], strides = [1, 1]} : vector<16x32xf32> to vector<16x8xf32>
    %cst_14 = arith.constant dense<0.000000e+00> : vector<16x16xf32>
    %31 = tpu.matmul %29, %30, %cst_14 {dimension_numbers = #tpu.dot_dimension_numbers<[1], [1], [0], [0], [0, 0, 1, 0], [], []>} : vector<16x8xf32>, vector<16x8xf32>, vector<16x16xf32> -> vector<16x16xf32>
    %32 = arith.addf %31, %1 : vector<16x16xf32>
    %cst_15 = arith.constant dense<0xFF800000> : vector<16xf32>
    %33 = vector.multi_reduction <maximumf>, %32, %cst_15 [1] : vector<16x16xf32> to vector<16xf32>
    %34 = vector.shape_cast %33 : vector<16xf32> to vector<16x1xf32>
    %35 = vector.broadcast %34 : vector<16x1xf32> to vector<16x16xf32>
    %36 = arith.subf %32, %35 : vector<16x16xf32>
    %37 = math.exp %36 : vector<16x16xf32>
    %cst_16 = arith.constant dense<0.000000e+00> : vector<16xf32>
    %38 = vector.multi_reduction <add>, %37, %cst_16 [1] : vector<16x16xf32> to vector<16xf32>
    %39 = vector.shape_cast %38 : vector<16xf32> to vector<16x1xf32>
    %40 = vector.broadcast %39 : vector<16x1xf32> to vector<16x16xf32>
    %41 = arith.divf %37, %40 : vector<16x16xf32>
    %42 = vector.extract_strided_slice %13 {offsets = [0, 8], sizes = [16, 8], strides = [1, 1]} : vector<16x32xf32> to vector<16x8xf32>
    %cst_17 = arith.constant dense<0.000000e+00> : vector<16x8xf32>
    %43 = tpu.matmul %41, %42, %cst_17 {dimension_numbers = #tpu.dot_dimension_numbers<[1], [0], [0], [1], [0, 0, 1, 1], [], []>} : vector<16x16xf32>, vector<16x8xf32>, vector<16x8xf32> -> vector<16x8xf32>
    %44 = vector.extract_strided_slice %11 {offsets = [0, 16], sizes = [16, 8], strides = [1, 1]} : vector<16x32xf32> to vector<16x8xf32>
    %45 = vector.extract_strided_slice %12 {offsets = [0, 16], sizes = [16, 8], strides = [1, 1]} : vector<16x32xf32> to vector<16x8xf32>
    %cst_18 = arith.constant dense<0.000000e+00> : vector<16x16xf32>
    %46 = tpu.matmul %44, %45, %cst_18 {dimension_numbers = #tpu.dot_dimension_numbers<[1], [1], [0], [0], [0, 0, 1, 0], [], []>} : vector<16x8xf32>, vector<16x8xf32>, vector<16x16xf32> -> vector<16x16xf32>
    %47 = arith.addf %46, %1 : vector<16x16xf32>
    %cst_19 = arith.constant dense<0xFF800000> : vector<16xf32>
    %48 = vector.multi_reduction <maximumf>, %47, %cst_19 [1] : vector<16x16xf32> to vector<16xf32>
    %49 = vector.shape_cast %48 : vector<16xf32> to vector<16x1xf32>
    %50 = vector.broadcast %49 : vector<16x1xf32> to vector<16x16xf32>
    %51 = arith.subf %47, %50 : vector<16x16xf32>
    %52 = math.exp %51 : vector<16x16xf32>
    %cst_20 = arith.constant dense<0.000000e+00> : vector<16xf32>
    %53 = vector.multi_reduction <add>, %52, %cst_20 [1] : vector<16x16xf32> to vector<16xf32>
    %54 = vector.shape_cast %53 : vector<16xf32> to vector<16x1xf32>
    %55 = vector.broadcast %54 : vector<16x1xf32> to vector<16x16xf32>
    %56 = arith.divf %52, %55 : vector<16x16xf32>
    %57 = vector.extract_strided_slice %13 {offsets = [0, 16], sizes = [16, 8], strides = [1, 1]} : vector<16x32xf32> to vector<16x8xf32>
    %cst_21 = arith.constant dense<0.000000e+00> : vector<16x8xf32>
    %58 = tpu.matmul %56, %57, %cst_21 {dimension_numbers = #tpu.dot_dimension_numbers<[1], [0], [0], [1], [0, 0, 1, 1], [], []>} : vector<16x16xf32>, vector<16x8xf32>, vector<16x8xf32> -> vector<16x8xf32>
    %59 = vector.extract_strided_slice %11 {offsets = [0, 24], sizes = [16, 8], strides = [1, 1]} : vector<16x32xf32> to vector<16x8xf32>
    %60 = vector.extract_strided_slice %12 {offsets = [0, 24], sizes = [16, 8], strides = [1, 1]} : vector<16x32xf32> to vector<16x8xf32>
    %cst_22 = arith.constant dense<0.000000e+00> : vector<16x16xf32>
    %61 = tpu.matmul %59, %60, %cst_22 {dimension_numbers = #tpu.dot_dimension_numbers<[1], [1], [0], [0], [0, 0, 1, 0], [], []>} : vector<16x8xf32>, vector<16x8xf32>, vector<16x16xf32> -> vector<16x16xf32>
    %62 = arith.addf %61, %1 : vector<16x16xf32>
    %cst_23 = arith.constant dense<0xFF800000> : vector<16xf32>
    %63 = vector.multi_reduction <maximumf>, %62, %cst_23 [1] : vector<16x16xf32> to vector<16xf32>
    %64 = vector.shape_cast %63 : vector<16xf32> to vector<16x1xf32>
    %65 = vector.broadcast %64 : vector<16x1xf32> to vector<16x16xf32>
    %66 = arith.subf %62, %65 : vector<16x16xf32>
    %67 = math.exp %66 : vector<16x16xf32>
    %cst_24 = arith.constant dense<0.000000e+00> : vector<16xf32>
    %68 = vector.multi_reduction <add>, %67, %cst_24 [1] : vector<16x16xf32> to vector<16xf32>
    %69 = vector.shape_cast %68 : vector<16xf32> to vector<16x1xf32>
    %70 = vector.broadcast %69 : vector<16x1xf32> to vector<16x16xf32>
    %71 = arith.divf %67, %70 : vector<16x16xf32>
    %72 = vector.extract_strided_slice %13 {offsets = [0, 24], sizes = [16, 8], strides = [1, 1]} : vector<16x32xf32> to vector<16x8xf32>
    %cst_25 = arith.constant dense<0.000000e+00> : vector<16x8xf32>
    %73 = tpu.matmul %71, %72, %cst_25 {dimension_numbers = #tpu.dot_dimension_numbers<[1], [0], [0], [1], [0, 0, 1, 1], [], []>} : vector<16x16xf32>, vector<16x8xf32>, vector<16x8xf32> -> vector<16x8xf32>
    %74 = tpu.concatenate %28, %43, %58, %73 in 1 : vector<16x8xf32>, vector<16x8xf32>, vector<16x8xf32>, vector<16x8xf32> -> vector<16x32xf32>
    %c0_26 = arith.constant 0 : index
    %c0_27 = arith.constant 0 : index
    %c0_28 = arith.constant 0 : index
    %75 = vector.load %arg4[%c0_26, %c0_27, %c0_28] : memref<2x32x32xf32, #tpu.memory_space<vmem>>, vector<1x32x32xf32>
    %76 = vector.shape_cast %75 : vector<1x32x32xf32> to vector<32x32xf32>
    %cst_29 = arith.constant dense<0.000000e+00> : vector<16x32xf32>
    %77 = tpu.matmul %74, %76, %cst_29 {dimension_numbers = #tpu.dot_dimension_numbers<[1], [0], [0], [1], [0, 0, 1, 1], [], []>} : vector<16x32xf32>, vector<32x32xf32>, vector<16x32xf32> -> vector<16x32xf32>
    %c0_30 = arith.constant 0 : index
    %c0_31 = arith.constant 0 : index
    %c0_32 = arith.constant 0 : index
    %78 = vector.load %arg5[%c0_30, %c0_31, %c0_32] : memref<2x1x32xf32, #tpu.memory_space<vmem>>, vector<1x1x32xf32>
    %79 = vector.shape_cast %78 : vector<1x1x32xf32> to vector<1x32xf32>
    %80 = vector.broadcast %79 : vector<1x32xf32> to vector<16x32xf32>
    %81 = arith.addf %77, %80 : vector<16x32xf32>
    %82 = arith.addf %0, %81 : vector<16x32xf32>
    %c0_33 = arith.constant 0 : index
    %c0_34 = arith.constant 0 : index
    %c0_35 = arith.constant 0 : index
    %83 = vector.load %arg6[%c0_33, %c0_34, %c0_35] : memref<2x1x32xf32, #tpu.memory_space<vmem>>, vector<1x1x32xf32>
    %84 = vector.shape_cast %83 : vector<1x1x32xf32> to vector<1x32xf32>
    %c0_36 = arith.constant 0 : index
    %c0_37 = arith.constant 0 : index
    %c0_38 = arith.constant 0 : index
    %85 = vector.load %arg7[%c0_36, %c0_37, %c0_38] : memref<2x1x32xf32, #tpu.memory_space<vmem>>, vector<1x1x32xf32>
    %86 = vector.shape_cast %85 : vector<1x1x32xf32> to vector<1x32xf32>
    %cst_39 = arith.constant dense<0.000000e+00> : vector<16xf32>
    %87 = vector.multi_reduction <add>, %82, %cst_39 [1] : vector<16x32xf32> to vector<16xf32>
    %88 = vector.shape_cast %87 : vector<16xf32> to vector<16x1xf32>
    %cst_40 = arith.constant 3.200000e+01 : f32
    %89 = vector.broadcast %cst_40 : f32 to vector<16x1xf32>
    %90 = arith.divf %88, %89 : vector<16x1xf32>
    %91 = vector.broadcast %90 : vector<16x1xf32> to vector<16x32xf32>
    %92 = arith.subf %82, %91 : vector<16x32xf32>
    %93 = arith.mulf %92, %92 : vector<16x32xf32>
    %cst_41 = arith.constant dense<0.000000e+00> : vector<16xf32>
    %94 = vector.multi_reduction <add>, %93, %cst_41 [1] : vector<16x32xf32> to vector<16xf32>
    %95 = vector.shape_cast %94 : vector<16xf32> to vector<16x1xf32>
    %cst_42 = arith.constant 3.200000e+01 : f32
    %96 = vector.broadcast %cst_42 : f32 to vector<16x1xf32>
    %97 = arith.divf %95, %96 : vector<16x1xf32>
    %98 = vector.broadcast %90 : vector<16x1xf32> to vector<16x32xf32>
    %99 = arith.subf %82, %98 : vector<16x32xf32>
    %cst_43 = arith.constant 9.99999974E-6 : f32
    %100 = vector.broadcast %cst_43 : f32 to vector<16x1xf32>
    %101 = arith.addf %97, %100 : vector<16x1xf32>
    %102 = math.rsqrt %101 : vector<16x1xf32>
    %103 = vector.broadcast %102 : vector<16x1xf32> to vector<16x32xf32>
    %104 = arith.mulf %99, %103 : vector<16x32xf32>
    %105 = vector.broadcast %84 : vector<1x32xf32> to vector<16x32xf32>
    %106 = arith.mulf %104, %105 : vector<16x32xf32>
    %107 = vector.broadcast %86 : vector<1x32xf32> to vector<16x32xf32>
    %108 = arith.addf %106, %107 : vector<16x32xf32>
    %c0_44 = arith.constant 0 : index
    %c0_45 = arith.constant 0 : index
    %c0_46 = arith.constant 0 : index
    %109 = vector.load %arg8[%c0_44, %c0_45, %c0_46] : memref<2x32x64xf32, #tpu.memory_space<vmem>>, vector<1x32x64xf32>
    %110 = vector.shape_cast %109 : vector<1x32x64xf32> to vector<32x64xf32>
    %cst_47 = arith.constant dense<0.000000e+00> : vector<16x64xf32>
    %111 = tpu.matmul %108, %110, %cst_47 {dimension_numbers = #tpu.dot_dimension_numbers<[1], [0], [0], [1], [0, 0, 1, 1], [], []>} : vector<16x32xf32>, vector<32x64xf32>, vector<16x64xf32> -> vector<16x64xf32>
    %c0_48 = arith.constant 0 : index
    %c0_49 = arith.constant 0 : index
    %c0_50 = arith.constant 0 : index
    %112 = vector.load %arg9[%c0_48, %c0_49, %c0_50] : memref<2x1x64xf32, #tpu.memory_space<vmem>>, vector<1x1x64xf32>
    %113 = vector.shape_cast %112 : vector<1x1x64xf32> to vector<1x64xf32>
    %114 = vector.broadcast %113 : vector<1x64xf32> to vector<16x64xf32>
    %115 = arith.addf %111, %114 : vector<16x64xf32>
    %cst_51 = arith.constant 0.000000e+00 : f32
    %116 = vector.broadcast %cst_51 : f32 to vector<16x64xf32>
    %117 = arith.maximumf %115, %116 : vector<16x64xf32>
    %c0_52 = arith.constant 0 : index
    %c0_53 = arith.constant 0 : index
    %c0_54 = arith.constant 0 : index
    %118 = vector.load %arg10[%c0_52, %c0_53, %c0_54] : memref<2x64x32xf32, #tpu.memory_space<vmem>>, vector<1x64x32xf32>
    %119 = vector.shape_cast %118 : vector<1x64x32xf32> to vector<64x32xf32>
    %cst_55 = arith.constant dense<0.000000e+00> : vector<16x32xf32>
    %120 = tpu.matmul %117, %119, %cst_55 {dimension_numbers = #tpu.dot_dimension_numbers<[1], [0], [0], [1], [0, 0, 1, 1], [], []>} : vector<16x64xf32>, vector<64x32xf32>, vector<16x32xf32> -> vector<16x32xf32>
    %c0_56 = arith.constant 0 : index
    %c0_57 = arith.constant 0 : index
    %c0_58 = arith.constant 0 : index
    %121 = vector.load %arg11[%c0_56, %c0_57, %c0_58] : memref<2x1x32xf32, #tpu.memory_space<vmem>>, vector<1x1x32xf32>
    %122 = vector.shape_cast %121 : vector<1x1x32xf32> to vector<1x32xf32>
    %123 = vector.broadcast %122 : vector<1x32xf32> to vector<16x32xf32>
    %124 = arith.addf %120, %123 : vector<16x32xf32>
    %125 = arith.addf %108, %124 : vector<16x32xf32>
    %c0_59 = arith.constant 0 : index
    %c0_60 = arith.constant 0 : index
    %c0_61 = arith.constant 0 : index
    %126 = vector.load %arg12[%c0_59, %c0_60, %c0_61] : memref<2x1x32xf32, #tpu.memory_space<vmem>>, vector<1x1x32xf32>
    %127 = vector.shape_cast %126 : vector<1x1x32xf32> to vector<1x32xf32>
    %c0_62 = arith.constant 0 : index
    %c0_63 = arith.constant 0 : index
    %c0_64 = arith.constant 0 : index
    %128 = vector.load %arg13[%c0_62, %c0_63, %c0_64] : memref<2x1x32xf32, #tpu.memory_space<vmem>>, vector<1x1x32xf32>
    %129 = vector.shape_cast %128 : vector<1x1x32xf32> to vector<1x32xf32>
    %cst_65 = arith.constant dense<0.000000e+00> : vector<16xf32>
    %130 = vector.multi_reduction <add>, %125, %cst_65 [1] : vector<16x32xf32> to vector<16xf32>
    %131 = vector.shape_cast %130 : vector<16xf32> to vector<16x1xf32>
    %cst_66 = arith.constant 3.200000e+01 : f32
    %132 = vector.broadcast %cst_66 : f32 to vector<16x1xf32>
    %133 = arith.divf %131, %132 : vector<16x1xf32>
    %134 = vector.broadcast %133 : vector<16x1xf32> to vector<16x32xf32>
    %135 = arith.subf %125, %134 : vector<16x32xf32>
    %136 = arith.mulf %135, %135 : vector<16x32xf32>
    %cst_67 = arith.constant dense<0.000000e+00> : vector<16xf32>
    %137 = vector.multi_reduction <add>, %136, %cst_67 [1] : vector<16x32xf32> to vector<16xf32>
    %138 = vector.shape_cast %137 : vector<16xf32> to vector<16x1xf32>
    %cst_68 = arith.constant 3.200000e+01 : f32
    %139 = vector.broadcast %cst_68 : f32 to vector<16x1xf32>
    %140 = arith.divf %138, %139 : vector<16x1xf32>
    %141 = vector.broadcast %133 : vector<16x1xf32> to vector<16x32xf32>
    %142 = arith.subf %125, %141 : vector<16x32xf32>
    %cst_69 = arith.constant 9.99999974E-6 : f32
    %143 = vector.broadcast %cst_69 : f32 to vector<16x1xf32>
    %144 = arith.addf %140, %143 : vector<16x1xf32>
    %145 = math.rsqrt %144 : vector<16x1xf32>
    %146 = vector.broadcast %145 : vector<16x1xf32> to vector<16x32xf32>
    %147 = arith.mulf %142, %146 : vector<16x32xf32>
    %148 = vector.broadcast %127 : vector<1x32xf32> to vector<16x32xf32>
    %149 = arith.mulf %147, %148 : vector<16x32xf32>
    %150 = vector.broadcast %129 : vector<1x32xf32> to vector<16x32xf32>
    %151 = arith.addf %149, %150 : vector<16x32xf32>
    %c1 = arith.constant 1 : index
    %c0_70 = arith.constant 0 : index
    %c0_71 = arith.constant 0 : index
    %152 = vector.load %arg2[%c1, %c0_70, %c0_71] : memref<2x32x96xf32, #tpu.memory_space<vmem>>, vector<1x32x96xf32>
    %153 = vector.shape_cast %152 : vector<1x32x96xf32> to vector<32x96xf32>
    %cst_72 = arith.constant dense<0.000000e+00> : vector<16x96xf32>
    %154 = tpu.matmul %151, %153, %cst_72 {dimension_numbers = #tpu.dot_dimension_numbers<[1], [0], [0], [1], [0, 0, 1, 1], [], []>} : vector<16x32xf32>, vector<32x96xf32>, vector<16x96xf32> -> vector<16x96xf32>
    %c1_73 = arith.constant 1 : index
    %c0_74 = arith.constant 0 : index
    %c0_75 = arith.constant 0 : index
    %155 = vector.load %arg3[%c1_73, %c0_74, %c0_75] : memref<2x1x96xf32, #tpu.memory_space<vmem>>, vector<1x1x96xf32>
    %156 = vector.shape_cast %155 : vector<1x1x96xf32> to vector<1x96xf32>
    %157 = vector.broadcast %156 : vector<1x96xf32> to vector<16x96xf32>
    %158 = arith.addf %154, %157 : vector<16x96xf32>
    %159 = vector.extract_strided_slice %158 {offsets = [0, 0], sizes = [16, 32], strides = [1, 1]} : vector<16x96xf32> to vector<16x32xf32>
    %cst_76 = arith.constant 0.353553385 : f32
    %160 = vector.broadcast %cst_76 : f32 to vector<16x32xf32>
    %161 = arith.mulf %159, %160 : vector<16x32xf32>
    %162 = vector.extract_strided_slice %158 {offsets = [0, 32], sizes = [16, 32], strides = [1, 1]} : vector<16x96xf32> to vector<16x32xf32>
    %163 = vector.extract_strided_slice %158 {offsets = [0, 64], sizes = [16, 32], strides = [1, 1]} : vector<16x96xf32> to vector<16x32xf32>
    %164 = vector.extract_strided_slice %161 {offsets = [0, 0], sizes = [16, 8], strides = [1, 1]} : vector<16x32xf32> to vector<16x8xf32>
    %165 = vector.extract_strided_slice %162 {offsets = [0, 0], sizes = [16, 8], strides = [1, 1]} : vector<16x32xf32> to vector<16x8xf32>
    %cst_77 = arith.constant dense<0.000000e+00> : vector<16x16xf32>
    %166 = tpu.matmul %164, %165, %cst_77 {dimension_numbers = #tpu.dot_dimension_numbers<[1], [1], [0], [0], [0, 0, 1, 0], [], []>} : vector<16x8xf32>, vector<16x8xf32>, vector<16x16xf32> -> vector<16x16xf32>
    %167 = arith.addf %166, %1 : vector<16x16xf32>
    %cst_78 = arith.constant dense<0xFF800000> : vector<16xf32>
    %168 = vector.multi_reduction <maximumf>, %167, %cst_78 [1] : vector<16x16xf32> to vector<16xf32>
    %169 = vector.shape_cast %168 : vector<16xf32> to vector<16x1xf32>
    %170 = vector.broadcast %169 : vector<16x1xf32> to vector<16x16xf32>
    %171 = arith.subf %167, %170 : vector<16x16xf32>
    %172 = math.exp %171 : vector<16x16xf32>
    %cst_79 = arith.constant dense<0.000000e+00> : vector<16xf32>
    %173 = vector.multi_reduction <add>, %172, %cst_79 [1] : vector<16x16xf32> to vector<16xf32>
    %174 = vector.shape_cast %173 : vector<16xf32> to vector<16x1xf32>
    %175 = vector.broadcast %174 : vector<16x1xf32> to vector<16x16xf32>
    %176 = arith.divf %172, %175 : vector<16x16xf32>
    %177 = vector.extract_strided_slice %163 {offsets = [0, 0], sizes = [16, 8], strides = [1, 1]} : vector<16x32xf32> to vector<16x8xf32>
    %cst_80 = arith.constant dense<0.000000e+00> : vector<16x8xf32>
    %178 = tpu.matmul %176, %177, %cst_80 {dimension_numbers = #tpu.dot_dimension_numbers<[1], [0], [0], [1], [0, 0, 1, 1], [], []>} : vector<16x16xf32>, vector<16x8xf32>, vector<16x8xf32> -> vector<16x8xf32>
    %179 = vector.extract_strided_slice %161 {offsets = [0, 8], sizes = [16, 8], strides = [1, 1]} : vector<16x32xf32> to vector<16x8xf32>
    %180 = vector.extract_strided_slice %162 {offsets = [0, 8], sizes = [16, 8], strides = [1, 1]} : vector<16x32xf32> to vector<16x8xf32>
    %cst_81 = arith.constant dense<0.000000e+00> : vector<16x16xf32>
    %181 = tpu.matmul %179, %180, %cst_81 {dimension_numbers = #tpu.dot_dimension_numbers<[1], [1], [0], [0], [0, 0, 1, 0], [], []>} : vector<16x8xf32>, vector<16x8xf32>, vector<16x16xf32> -> vector<16x16xf32>
    %182 = arith.addf %181, %1 : vector<16x16xf32>
    %cst_82 = arith.constant dense<0xFF800000> : vector<16xf32>
    %183 = vector.multi_reduction <maximumf>, %182, %cst_82 [1] : vector<16x16xf32> to vector<16xf32>
    %184 = vector.shape_cast %183 : vector<16xf32> to vector<16x1xf32>
    %185 = vector.broadcast %184 : vector<16x1xf32> to vector<16x16xf32>
    %186 = arith.subf %182, %185 : vector<16x16xf32>
    %187 = math.exp %186 : vector<16x16xf32>
    %cst_83 = arith.constant dense<0.000000e+00> : vector<16xf32>
    %188 = vector.multi_reduction <add>, %187, %cst_83 [1] : vector<16x16xf32> to vector<16xf32>
    %189 = vector.shape_cast %188 : vector<16xf32> to vector<16x1xf32>
    %190 = vector.broadcast %189 : vector<16x1xf32> to vector<16x16xf32>
    %191 = arith.divf %187, %190 : vector<16x16xf32>
    %192 = vector.extract_strided_slice %163 {offsets = [0, 8], sizes = [16, 8], strides = [1, 1]} : vector<16x32xf32> to vector<16x8xf32>
    %cst_84 = arith.constant dense<0.000000e+00> : vector<16x8xf32>
    %193 = tpu.matmul %191, %192, %cst_84 {dimension_numbers = #tpu.dot_dimension_numbers<[1], [0], [0], [1], [0, 0, 1, 1], [], []>} : vector<16x16xf32>, vector<16x8xf32>, vector<16x8xf32> -> vector<16x8xf32>
    %194 = vector.extract_strided_slice %161 {offsets = [0, 16], sizes = [16, 8], strides = [1, 1]} : vector<16x32xf32> to vector<16x8xf32>
    %195 = vector.extract_strided_slice %162 {offsets = [0, 16], sizes = [16, 8], strides = [1, 1]} : vector<16x32xf32> to vector<16x8xf32>
    %cst_85 = arith.constant dense<0.000000e+00> : vector<16x16xf32>
    %196 = tpu.matmul %194, %195, %cst_85 {dimension_numbers = #tpu.dot_dimension_numbers<[1], [1], [0], [0], [0, 0, 1, 0], [], []>} : vector<16x8xf32>, vector<16x8xf32>, vector<16x16xf32> -> vector<16x16xf32>
    %197 = arith.addf %196, %1 : vector<16x16xf32>
    %cst_86 = arith.constant dense<0xFF800000> : vector<16xf32>
    %198 = vector.multi_reduction <maximumf>, %197, %cst_86 [1] : vector<16x16xf32> to vector<16xf32>
    %199 = vector.shape_cast %198 : vector<16xf32> to vector<16x1xf32>
    %200 = vector.broadcast %199 : vector<16x1xf32> to vector<16x16xf32>
    %201 = arith.subf %197, %200 : vector<16x16xf32>
    %202 = math.exp %201 : vector<16x16xf32>
    %cst_87 = arith.constant dense<0.000000e+00> : vector<16xf32>
    %203 = vector.multi_reduction <add>, %202, %cst_87 [1] : vector<16x16xf32> to vector<16xf32>
    %204 = vector.shape_cast %203 : vector<16xf32> to vector<16x1xf32>
    %205 = vector.broadcast %204 : vector<16x1xf32> to vector<16x16xf32>
    %206 = arith.divf %202, %205 : vector<16x16xf32>
    %207 = vector.extract_strided_slice %163 {offsets = [0, 16], sizes = [16, 8], strides = [1, 1]} : vector<16x32xf32> to vector<16x8xf32>
    %cst_88 = arith.constant dense<0.000000e+00> : vector<16x8xf32>
    %208 = tpu.matmul %206, %207, %cst_88 {dimension_numbers = #tpu.dot_dimension_numbers<[1], [0], [0], [1], [0, 0, 1, 1], [], []>} : vector<16x16xf32>, vector<16x8xf32>, vector<16x8xf32> -> vector<16x8xf32>
    %209 = vector.extract_strided_slice %161 {offsets = [0, 24], sizes = [16, 8], strides = [1, 1]} : vector<16x32xf32> to vector<16x8xf32>
    %210 = vector.extract_strided_slice %162 {offsets = [0, 24], sizes = [16, 8], strides = [1, 1]} : vector<16x32xf32> to vector<16x8xf32>
    %cst_89 = arith.constant dense<0.000000e+00> : vector<16x16xf32>
    %211 = tpu.matmul %209, %210, %cst_89 {dimension_numbers = #tpu.dot_dimension_numbers<[1], [1], [0], [0], [0, 0, 1, 0], [], []>} : vector<16x8xf32>, vector<16x8xf32>, vector<16x16xf32> -> vector<16x16xf32>
    %212 = arith.addf %211, %1 : vector<16x16xf32>
    %cst_90 = arith.constant dense<0xFF800000> : vector<16xf32>
    %213 = vector.multi_reduction <maximumf>, %212, %cst_90 [1] : vector<16x16xf32> to vector<16xf32>
    %214 = vector.shape_cast %213 : vector<16xf32> to vector<16x1xf32>
    %215 = vector.broadcast %214 : vector<16x1xf32> to vector<16x16xf32>
    %216 = arith.subf %212, %215 : vector<16x16xf32>
    %217 = math.exp %216 : vector<16x16xf32>
    %cst_91 = arith.constant dense<0.000000e+00> : vector<16xf32>
    %218 = vector.multi_reduction <add>, %217, %cst_91 [1] : vector<16x16xf32> to vector<16xf32>
    %219 = vector.shape_cast %218 : vector<16xf32> to vector<16x1xf32>
    %220 = vector.broadcast %219 : vector<16x1xf32> to vector<16x16xf32>
    %221 = arith.divf %217, %220 : vector<16x16xf32>
    %222 = vector.extract_strided_slice %163 {offsets = [0, 24], sizes = [16, 8], strides = [1, 1]} : vector<16x32xf32> to vector<16x8xf32>
    %cst_92 = arith.constant dense<0.000000e+00> : vector<16x8xf32>
    %223 = tpu.matmul %221, %222, %cst_92 {dimension_numbers = #tpu.dot_dimension_numbers<[1], [0], [0], [1], [0, 0, 1, 1], [], []>} : vector<16x16xf32>, vector<16x8xf32>, vector<16x8xf32> -> vector<16x8xf32>
    %224 = tpu.concatenate %178, %193, %208, %223 in 1 : vector<16x8xf32>, vector<16x8xf32>, vector<16x8xf32>, vector<16x8xf32> -> vector<16x32xf32>
    %c1_93 = arith.constant 1 : index
    %c0_94 = arith.constant 0 : index
    %c0_95 = arith.constant 0 : index
    %225 = vector.load %arg4[%c1_93, %c0_94, %c0_95] : memref<2x32x32xf32, #tpu.memory_space<vmem>>, vector<1x32x32xf32>
    %226 = vector.shape_cast %225 : vector<1x32x32xf32> to vector<32x32xf32>
    %cst_96 = arith.constant dense<0.000000e+00> : vector<16x32xf32>
    %227 = tpu.matmul %224, %226, %cst_96 {dimension_numbers = #tpu.dot_dimension_numbers<[1], [0], [0], [1], [0, 0, 1, 1], [], []>} : vector<16x32xf32>, vector<32x32xf32>, vector<16x32xf32> -> vector<16x32xf32>
    %c1_97 = arith.constant 1 : index
    %c0_98 = arith.constant 0 : index
    %c0_99 = arith.constant 0 : index
    %228 = vector.load %arg5[%c1_97, %c0_98, %c0_99] : memref<2x1x32xf32, #tpu.memory_space<vmem>>, vector<1x1x32xf32>
    %229 = vector.shape_cast %228 : vector<1x1x32xf32> to vector<1x32xf32>
    %230 = vector.broadcast %229 : vector<1x32xf32> to vector<16x32xf32>
    %231 = arith.addf %227, %230 : vector<16x32xf32>
    %232 = arith.addf %151, %231 : vector<16x32xf32>
    %c1_100 = arith.constant 1 : index
    %c0_101 = arith.constant 0 : index
    %c0_102 = arith.constant 0 : index
    %233 = vector.load %arg6[%c1_100, %c0_101, %c0_102] : memref<2x1x32xf32, #tpu.memory_space<vmem>>, vector<1x1x32xf32>
    %234 = vector.shape_cast %233 : vector<1x1x32xf32> to vector<1x32xf32>
    %c1_103 = arith.constant 1 : index
    %c0_104 = arith.constant 0 : index
    %c0_105 = arith.constant 0 : index
    %235 = vector.load %arg7[%c1_103, %c0_104, %c0_105] : memref<2x1x32xf32, #tpu.memory_space<vmem>>, vector<1x1x32xf32>
    %236 = vector.shape_cast %235 : vector<1x1x32xf32> to vector<1x32xf32>
    %cst_106 = arith.constant dense<0.000000e+00> : vector<16xf32>
    %237 = vector.multi_reduction <add>, %232, %cst_106 [1] : vector<16x32xf32> to vector<16xf32>
    %238 = vector.shape_cast %237 : vector<16xf32> to vector<16x1xf32>
    %cst_107 = arith.constant 3.200000e+01 : f32
    %239 = vector.broadcast %cst_107 : f32 to vector<16x1xf32>
    %240 = arith.divf %238, %239 : vector<16x1xf32>
    %241 = vector.broadcast %240 : vector<16x1xf32> to vector<16x32xf32>
    %242 = arith.subf %232, %241 : vector<16x32xf32>
    %243 = arith.mulf %242, %242 : vector<16x32xf32>
    %cst_108 = arith.constant dense<0.000000e+00> : vector<16xf32>
    %244 = vector.multi_reduction <add>, %243, %cst_108 [1] : vector<16x32xf32> to vector<16xf32>
    %245 = vector.shape_cast %244 : vector<16xf32> to vector<16x1xf32>
    %cst_109 = arith.constant 3.200000e+01 : f32
    %246 = vector.broadcast %cst_109 : f32 to vector<16x1xf32>
    %247 = arith.divf %245, %246 : vector<16x1xf32>
    %248 = vector.broadcast %240 : vector<16x1xf32> to vector<16x32xf32>
    %249 = arith.subf %232, %248 : vector<16x32xf32>
    %cst_110 = arith.constant 9.99999974E-6 : f32
    %250 = vector.broadcast %cst_110 : f32 to vector<16x1xf32>
    %251 = arith.addf %247, %250 : vector<16x1xf32>
    %252 = math.rsqrt %251 : vector<16x1xf32>
    %253 = vector.broadcast %252 : vector<16x1xf32> to vector<16x32xf32>
    %254 = arith.mulf %249, %253 : vector<16x32xf32>
    %255 = vector.broadcast %234 : vector<1x32xf32> to vector<16x32xf32>
    %256 = arith.mulf %254, %255 : vector<16x32xf32>
    %257 = vector.broadcast %236 : vector<1x32xf32> to vector<16x32xf32>
    %258 = arith.addf %256, %257 : vector<16x32xf32>
    %c1_111 = arith.constant 1 : index
    %c0_112 = arith.constant 0 : index
    %c0_113 = arith.constant 0 : index
    %259 = vector.load %arg8[%c1_111, %c0_112, %c0_113] : memref<2x32x64xf32, #tpu.memory_space<vmem>>, vector<1x32x64xf32>
    %260 = vector.shape_cast %259 : vector<1x32x64xf32> to vector<32x64xf32>
    %cst_114 = arith.constant dense<0.000000e+00> : vector<16x64xf32>
    %261 = tpu.matmul %258, %260, %cst_114 {dimension_numbers = #tpu.dot_dimension_numbers<[1], [0], [0], [1], [0, 0, 1, 1], [], []>} : vector<16x32xf32>, vector<32x64xf32>, vector<16x64xf32> -> vector<16x64xf32>
    %c1_115 = arith.constant 1 : index
    %c0_116 = arith.constant 0 : index
    %c0_117 = arith.constant 0 : index
    %262 = vector.load %arg9[%c1_115, %c0_116, %c0_117] : memref<2x1x64xf32, #tpu.memory_space<vmem>>, vector<1x1x64xf32>
    %263 = vector.shape_cast %262 : vector<1x1x64xf32> to vector<1x64xf32>
    %264 = vector.broadcast %263 : vector<1x64xf32> to vector<16x64xf32>
    %265 = arith.addf %261, %264 : vector<16x64xf32>
    %cst_118 = arith.constant 0.000000e+00 : f32
    %266 = vector.broadcast %cst_118 : f32 to vector<16x64xf32>
    %267 = arith.maximumf %265, %266 : vector<16x64xf32>
    %c1_119 = arith.constant 1 : index
    %c0_120 = arith.constant 0 : index
    %c0_121 = arith.constant 0 : index
    %268 = vector.load %arg10[%c1_119, %c0_120, %c0_121] : memref<2x64x32xf32, #tpu.memory_space<vmem>>, vector<1x64x32xf32>
    %269 = vector.shape_cast %268 : vector<1x64x32xf32> to vector<64x32xf32>
    %cst_122 = arith.constant dense<0.000000e+00> : vector<16x32xf32>
    %270 = tpu.matmul %267, %269, %cst_122 {dimension_numbers = #tpu.dot_dimension_numbers<[1], [0], [0], [1], [0, 0, 1, 1], [], []>} : vector<16x64xf32>, vector<64x32xf32>, vector<16x32xf32> -> vector<16x32xf32>
    %c1_123 = arith.constant 1 : index
    %c0_124 = arith.constant 0 : index
    %c0_125 = arith.constant 0 : index
    %271 = vector.load %arg11[%c1_123, %c0_124, %c0_125] : memref<2x1x32xf32, #tpu.memory_space<vmem>>, vector<1x1x32xf32>
    %272 = vector.shape_cast %271 : vector<1x1x32xf32> to vector<1x32xf32>
    %273 = vector.broadcast %272 : vector<1x32xf32> to vector<16x32xf32>
    %274 = arith.addf %270, %273 : vector<16x32xf32>
    %275 = arith.addf %258, %274 : vector<16x32xf32>
    %c1_126 = arith.constant 1 : index
    %c0_127 = arith.constant 0 : index
    %c0_128 = arith.constant 0 : index
    %276 = vector.load %arg12[%c1_126, %c0_127, %c0_128] : memref<2x1x32xf32, #tpu.memory_space<vmem>>, vector<1x1x32xf32>
    %277 = vector.shape_cast %276 : vector<1x1x32xf32> to vector<1x32xf32>
    %c1_129 = arith.constant 1 : index
    %c0_130 = arith.constant 0 : index
    %c0_131 = arith.constant 0 : index
    %278 = vector.load %arg13[%c1_129, %c0_130, %c0_131] : memref<2x1x32xf32, #tpu.memory_space<vmem>>, vector<1x1x32xf32>
    %279 = vector.shape_cast %278 : vector<1x1x32xf32> to vector<1x32xf32>
    %cst_132 = arith.constant dense<0.000000e+00> : vector<16xf32>
    %280 = vector.multi_reduction <add>, %275, %cst_132 [1] : vector<16x32xf32> to vector<16xf32>
    %281 = vector.shape_cast %280 : vector<16xf32> to vector<16x1xf32>
    %cst_133 = arith.constant 3.200000e+01 : f32
    %282 = vector.broadcast %cst_133 : f32 to vector<16x1xf32>
    %283 = arith.divf %281, %282 : vector<16x1xf32>
    %284 = vector.broadcast %283 : vector<16x1xf32> to vector<16x32xf32>
    %285 = arith.subf %275, %284 : vector<16x32xf32>
    %286 = arith.mulf %285, %285 : vector<16x32xf32>
    %cst_134 = arith.constant dense<0.000000e+00> : vector<16xf32>
    %287 = vector.multi_reduction <add>, %286, %cst_134 [1] : vector<16x32xf32> to vector<16xf32>
    %288 = vector.shape_cast %287 : vector<16xf32> to vector<16x1xf32>
    %cst_135 = arith.constant 3.200000e+01 : f32
    %289 = vector.broadcast %cst_135 : f32 to vector<16x1xf32>
    %290 = arith.divf %288, %289 : vector<16x1xf32>
    %291 = vector.broadcast %283 : vector<16x1xf32> to vector<16x32xf32>
    %292 = arith.subf %275, %291 : vector<16x32xf32>
    %cst_136 = arith.constant 9.99999974E-6 : f32
    %293 = vector.broadcast %cst_136 : f32 to vector<16x1xf32>
    %294 = arith.addf %290, %293 : vector<16x1xf32>
    %295 = math.rsqrt %294 : vector<16x1xf32>
    %296 = vector.broadcast %295 : vector<16x1xf32> to vector<16x32xf32>
    %297 = arith.mulf %292, %296 : vector<16x32xf32>
    %298 = vector.broadcast %277 : vector<1x32xf32> to vector<16x32xf32>
    %299 = arith.mulf %297, %298 : vector<16x32xf32>
    %300 = vector.broadcast %279 : vector<1x32xf32> to vector<16x32xf32>
    %301 = arith.addf %299, %300 : vector<16x32xf32>
    %c0_137 = arith.constant 0 : index
    %c0_138 = arith.constant 0 : index
    %302 = vector.load %arg14[%c0_137, %c0_138] : memref<16x32xf32, #tpu.memory_space<vmem>>, vector<16x32xf32>
    tpu.vector_store %arg14[%c0_137, %c0_138], %301 {strides = array<i32>} : memref<16x32xf32, #tpu.memory_space<vmem>>, vector<16x32xf32>,
    return
  }
}

</mosaic_0001>

<bundles_post_ra>
// kernel: tpu_custom_call.1
= control target key start
LH: loop header
LB: loop body
LE: loop exit
PB: predicated region body
PF: predicated region fallthrough
CT: control target
= control target key end

     0   :  { %19 = vsyncpa [#allocation3], 0  ;;  %s3925_s0 = inlined_call_operand.hbm [shape: f32[16,32], index: 0, kind: input, shape index: {}]   ;;  %s3926_s1 = inlined_call_operand.hbm [shape: f32[16,16], index: 1, kind: input, shape index: {}]   ;;  %s3927_s2 = inlined_call_operand.vmem [shape: f32[2,32,96], index: 2, kind: input, shape index: {}]   ;;  %s3928_s3 = inlined_call_operand.vmem [shape: f32[2,1,96], index: 3, kind: input, shape index: {}]   ;;  %s3929_s4 = inlined_call_operand.vmem [shape: f32[2,32,32], index: 4, kind: input, shape index: {}]   ;;  %s3930_s5 = inlined_call_operand.vmem [shape: f32[2,1,32], index: 5, kind: input, shape index: {}]   ;;  %s3931_s6 = inlined_call_operand.vmem [shape: f32[2,1,32], index: 6, kind: input, shape index: {}]   ;;  %s3932_s7 = inlined_call_operand.vmem [shape: f32[2,1,32], index: 7, kind: input, shape index: {}]   ;;  %s3933_s8 = inlined_call_operand.vmem [shape: f32[2,32,64], index: 8, kind: input, shape index: {}]   ;;  %s3934_s9 = inlined_call_operand.vmem [shape: f32[2,1,64], index: 9, kind: input, shape index: {}]   ;;  %s3935_s10 = inlined_call_operand.vmem [shape: f32[2,64,32], index: 10, kind: input, shape index: {}]   ;;  %s3936_s11 = inlined_call_operand.vmem [shape: f32[2,1,32], index: 11, kind: input, shape index: {}]   ;;  %s3937_s12 = inlined_call_operand.vmem [shape: f32[2,1,32], index: 12, kind: input, shape index: {}]   ;;  %s3938_s13 = inlined_call_operand.vmem [shape: f32[2,1,32], index: 13, kind: input, shape index: {}]   ;;  %s3939_s14 = inlined_call_operand.hbm [shape: f32[16,32], index: 14, kind: output, shape index: {}]  }
   0x1   :  { %20 = vsyncpa [#allocation6], 0 }
   0x2   :  { %21 = vsyncpa [#allocation4], 0  ;;  %s3324_s29 = smov [#allocation2]  }
   0x3   :  { %s27_s30 = sshll.u32 %s3324_s29, 4  ;;  %s28_s30 = int_to_ptr.vmem [resolvable:$true] %s27_s30 }
   0x4   :  { %s3266_s15 = scalar_lea.vmem %s28_s30, 256  ;;  %p3271_p1 = scmp.lt.s32.totalorder %s28_s30, %s28_s30 }
   0x5   :  { %p3267_p0 = scmp.ne.s32.totalorder %s28_s30, %s3266_s15  ;;  %p3272_p2 = scmp.lt.s32.totalorder %s3266_s15, %s3266_s15 }
   0x7   :  { %p3273_p3 = por %p3272_p2, %p3271_p1 }
   0x9   :  { %p3274_p4 = pnand %p3273_p3, %p3267_p0 }
   0xb   :  { %3277 = shalt.err (!%p3274_p4)
}
   0xc   :  { %s3940_s16 = smov 128   ;;  %s3943_s17 = smov 8  }
   0xd   :  { %33 = dma.hbm_to_vmem [thread:$0]  %s3925_s0, 256, %s28_s30, [#allocation3], %s3940_s16, %s3940_s16, %s3943_s17  }
   0xe   :  { %s3327_s20 = smov [#allocation5]  }
   0xf   :  { %s39_s21 = sshll.u32 %s3327_s20, 4  ;;  %s40_s21 = int_to_ptr.vmem [resolvable:$true] %s39_s21 }
  0x10   :  { %s3286_s22 = scalar_lea.vmem %s40_s21, 256  ;;  %p3291_p6 = scmp.lt.s32.totalorder %s40_s21, %s40_s21 }
  0x11   :  { %p3287_p5 = scmp.ne.s32.totalorder %s40_s21, %s3286_s22  ;;  %p3292_p7 = scmp.lt.s32.totalorder %s3286_s22, %s3286_s22 }
  0x13   :  { %p3293_p8 = por %p3292_p7, %p3291_p6 }
  0x15   :  { %p3294_p9 = pnand %p3293_p8, %p3287_p5 }
  0x17   :  { %3297 = shalt.err (!%p3294_p9)
}
  0x18   :  { %45 = dma.hbm_to_vmem [thread:$0]  %s3926_s1, 256, %s40_s21, [#allocation6], %s3940_s16, %s3940_s16, %s3943_s17  }
  0x19   :  { %3318 = dma.done.wait [#allocation3], 256  }
  0x1a   :  { %3319 = vsyncadd [#allocation3], 4294967040 }
  0x1b   :  { %3320 = dma.done.wait [#allocation6], 256  }
  0x1c   :  { %3321 = vsyncadd [#allocation6], 4294967040  ;;  %vm91_vm0 = vcmask 261120   ;;  %v83_v0 = vld [vmem:[%s3927_s2 + $0x18] sm:$0xff]  ;;  %v82_v1 = vld [vmem:[%s3927_s2 + $0x10] sm:$0xff]  ;;  %s3328_s19 = smov 88  }
  0x1d   :  { %2942 = vmatprep.subr.mxu1 %v83_v0  ;;  %v3435_v2 = vld [vmem:[#allocation2] sm:$0xff]  ;;  %v81_v3 = vld [vmem:[%s3927_s2 + $0x8] sm:$0xff]  ;;  %s3329_s20 = smov 96   ;;  %vm181_vm1 = vcmask 64512   ;;  %s3330_s21 = smov 120   ;;  %v3488_v19 = vld [vmem:[#allocation5 + $0x8] sm:$0xff] }
  0x1e   :  { %2943 = vmatpush3.msra.mxu1 %v83_v0  ;;  %2950 = vmatprep.mubr.msk.f32.mxu1 %vm91_vm0, %v3435_v2  ;;  %v80_v4 = vld [vmem:[%s3927_s2] sm:$0xff]  ;;  %v3445_v5 = vld [vmem:[#allocation2 + $0x8] sm:$0xff]  ;;  %v3490_v21 = vld [vmem:[#allocation5] sm:$0xff]  ;;  %vm267_vm2 = vcmask 130048   ;;  %s3331_s22 = smov 64   ;;  %s3332_s23 = smov 56  }
  0x1f   :  { %2944 = vmatprep.subr.mxu1 %v82_v1  ;;  %v2714_v6 = vld [vmem:[%s3928_s3] ss:$0 sm:$0xff]  ;;  %s3333_s24 = smov 80   ;;  %s3334_s0 = smov 112   ;;  %vm1005_vm3 = vcmask 195584   ;;  %vm1256_vm4 = vcmask 523264  }
  0x20   :  { %2945 = vmatpush3.msra.mxu1 %v82_v1  ;;  %s3335_s25 = smov 48   ;;  %s3336_s26 = smov 72  }
  0x21   :  { %2946 = vmatprep.subr.mxu1 %v81_v3  ;;  %s3337_s27 = smov 104   ;;  %s3945_s28 = smov 40  }
  0x22   :  { %2947 = vmatpush3.msra.mxu1 %v81_v3  ;;  %s3941_s29 = smov 16   ;;  %s3947_s1 = smov 24  }
  0x23   :  { %2948 = vmatprep.subr.mxu1 %v80_v4  ;;  %s3952_s16 = smov 24  }
  0x24   :  { %2949 = vmatpush3.msra.mxu1 %v80_v4 }
  0x25   :  { %2951 = vmatmul.mubr.msk.f32.vlgmr.msra.gmra.mxu1 %vm91_vm0, %v3445_v5 }
  0xe5   :  { %v2952_v7 = vpop.f32.mrf.mxu1 }
  0xe6   :  { %v3452_v8 = vadd.f32 %v2952_v7, %v2714_v6 }
  0xe7   :  { %v164_v9 = vpop.f32.mrf.mxu1 }
  0xe8   :  { %v3454_v10 = vadd.f32 %v2714_v6, %v164_v9  ;;  %383 = vrot.lane.b32.xlu1 %v3452_v8, %s3328_s19  ;;  %179 = vrot.lane.b32.xlu0 %v3452_v8, %s3329_s20  ;;  %v3470_v12 = vmul.f32 0.35355338, %v3452_v8 }
  0xea   :  { %v3461_v11 = vmul.f32 0.35355338, %v3454_v10 }
  0xec   :  { %381 = vrot.lane.b32.xlu1 %v3454_v10, %s3328_s19  ;;  %177 = vrot.lane.b32.xlu0 %v3454_v10, %s3329_s20 }
  0xed   :  { %2957 = vmatprep.mubr.msk.f32.mxu1 %vm181_vm1, %v3461_v11 }
  0xf0   :  { %379 = vrot.lane.b32.xlu1 %v3470_v12, %s3330_s21  ;;  %377 = vrot.lane.b32.xlu0 %v3461_v11, %s3330_s21 }
 0x15a   :  { %v180_v13 = vpop.permute.xlu0 %179  ;;  %v384_v14 = vpop.permute.xlu1 %383 }
 0x15b   :  { %2953 = vmatprep.subr.msk.mxu1 %vm181_vm1, %v180_v13 }
 0x15c   :  { %2954 = vmatpush3.xpose.msk.msra.mxu1 %vm181_vm1, %v180_v13 }
 0x15e   :  { %v178_v15 = vpop.permute.xlu0 %177  ;;  %v382_v17 = vpop.permute.xlu1 %381 }
 0x15f   :  { %2955 = vmatprep.subr.msk.mxu1 %vm181_vm1, %v178_v15 }
 0x160   :  { %2956 = vmatpush3.xpose.msk.msra.mxu1 %vm181_vm1, %v178_v15 }
 0x161   :  { %2967 = vmatprep.subr.msk.mxu1 %vm181_vm1, %v384_v14 }
 0x162   :  { %v378_v16 = vpop.permute.xlu0 %377  ;;  %v380_v18 = vpop.permute.xlu1 %379 }
 0x163   :  { %2958 = vmatmul.mubr.msk.f32.vlgmr.msra.gmra.mxu1 %vm181_vm1, %v3470_v12 }
 0x164   :  { %2968 = vmatpush3.xpose.msk.msra.mxu1 %vm181_vm1, %v384_v14  ;;  %2971 = vmatprep.mubr.msk.f32.mxu1 %vm181_vm1, %v378_v16 }
 0x165   :  { %2969 = vmatprep.subr.msk.mxu1 %vm181_vm1, %v382_v17 }
 0x168   :  { %2970 = vmatpush3.xpose.msk.msra.mxu1 %vm181_vm1, %v382_v17 }
 0x16b   :  { %2972 = vmatmul.mubr.msk.f32.vlgmr.msra.gmra.mxu1 %vm181_vm1, %v380_v18 }
 0x223   :  { %v2959_v20 = vpop.f32.mrf.mxu1 }
 0x224   :  { %v264_v22 = vadd.f32 %v2959_v20, %v3488_v19 }
 0x225   :  { %v258_v23 = vpop.f32.mrf.mxu1 }
 0x226   :  { %v259_v24 = vadd.f32 %v258_v23, %v3490_v21  ;;  %v271_v25 = vsel %vm267_vm2, %v264_v22, -inf }
 0x227   :  { %272 = vmax.xlane.f32.xlu1 %v271_v25 }
 0x228   :  { %v268_v26 = vsel %vm267_vm2, %v259_v24, -inf }
 0x229   :  { %269 = vmax.xlane.f32.xlu0 %v268_v26 }
 0x22b   :  { %v2973_v27 = vpop.f32.mrf.mxu1 }
 0x22c   :  { %v465_v30 = vadd.f32 %v2973_v27, %v3488_v19 }
 0x22d   :  { %v459_v28 = vpop.f32.mrf.mxu1 }
 0x22e   :  { %v460_v29 = vadd.f32 %v459_v28, %v3490_v21  ;;  %v471_v32 = vsel %vm267_vm2, %v465_v30, -inf }
 0x230   :  { %v468_v31 = vsel %vm267_vm2, %v460_v29, -inf }
 0x231   :  { %469 = vmax.xlane.f32.xlu0 %v468_v31 }
 0x235   :  { %472 = vmax.xlane.f32.xlu0 %v471_v32 }
 0x238   :  { %292 = vrot.lane.b32.xlu1 %v3452_v8, %s3331_s22 }
 0x23c   :  { %492 = vrot.lane.b32.xlu1 %v3452_v8, %s3332_s23 }
 0x240   :  { %490 = vrot.lane.b32.xlu1 %v3454_v10, %s3332_s23 }
 0x24b   :  { %290 = vrot.lane.b32.xlu0 %v3454_v10, %s3331_s22 }
 0x2b0   :  { %v273_v33 = vpop.xlane.xlu1 %272 }
 0x2b1   :  { %v275_v34 = vsub.f32 %v264_v22, %v273_v33 }
 0x2b2   :  { %v270_v35 = vpop.xlane.xlu0 %269 }
 0x2b3   :  { %v278_v36 = vmul.f32 1.442695, %v275_v34  ;;  %v274_v37 = vsub.f32 %v259_v24, %v270_v35 }
 0x2b4   :  { %v293_v38 = vpop.permute.xlu1 %292 }
 0x2b5   :  { %3176 = vpow2.f32 %v278_v36  ;;  %v276_v39 = vmul.f32 1.442695, %v274_v37  ;;  %2960 = vmatprep.subr.mxu0 %v293_v38 }
 0x2b6   :  { %2961 = vmatpush3.msra.mxu0 %v293_v38 }
 0x2b7   :  { %3178 = vpow2.f32 %v276_v39 }
 0x2b8   :  { %v493_v48 = vpop.permute.xlu1 %492 }
 0x2ba   :  { %v470_v40 = vpop.xlane.xlu0 %469 }
 0x2bb   :  { %v474_v52 = vsub.f32 %v460_v29, %v470_v40 }
 0x2bc   :  { %v491_v56 = vpop.permute.xlu1 %490 }
 0x2bd   :  { %v476_v53 = vmul.f32 1.442695, %v474_v52 }
 0x2be   :  { %v473_v41 = vpop.xlane.xlu0 %472 }
 0x2bf   :  { %v475_v42 = vsub.f32 %v465_v30, %v473_v41 }
 0x2c1   :  { %v478_v43 = vmul.f32 1.442695, %v475_v42 }
 0x2c2   :  { %v3177_v44 = vpop.eup %3176  ;;  %v291_v45 = vpop.permute.xlu0 %290 }
 0x2c3   :  { %3180 = vpow2.f32 %v478_v43  ;;  %2962 = vmatprep.subr.mxu0 %v291_v45  ;;  %v283_v46 = vsel %vm267_vm2, %v3177_v44, 0.0 }
 0x2c4   :  { %v3179_v47 = vpop.eup %3178  ;;  %284 = vadd.xlane.f32.xlu0 %v283_v46  ;;  %2963 = vmatpush3.msra.mxu0 %v291_v45  ;;  %3182 = vpow2.f32 %v476_v53 }
 0x2c5   :  { %2974 = vmatprep.subr.mxu0 %v493_v48  ;;  %v280_v49 = vsel %vm267_vm2, %v3179_v47, 0.0 }
 0x2c6   :  { %281 = vadd.xlane.f32.xlu1 %v280_v49 }
 0x2d0   :  { %v3181_v50 = vpop.eup %3180 }
 0x2d1   :  { %v483_v51 = vsel %vm267_vm2, %v3181_v50, 0.0  ;;  %v3183_v54 = vpop.eup %3182 }
 0x2d2   :  { %484 = vadd.xlane.f32.xlu0 %v483_v51  ;;  %v480_v55 = vsel %vm267_vm2, %v3183_v54, 0.0 }
 0x2d7   :  { %581 = vrot.lane.b32.xlu1 %v3454_v10, %s3333_s24 }
 0x2e8   :  { %583 = vrot.lane.b32.xlu0 %v3452_v8, %s3333_s24 }
 0x2ec   :  { %577 = vrot.lane.b32.xlu0 %v3461_v11, %s3334_s0 }
 0x2fb   :  { %481 = vadd.xlane.f32.xlu1 %v480_v55 }
 0x30c   :  { %579 = vrot.lane.b32.xlu1 %v3470_v12, %s3334_s0 }
 0x34d   :  { %v285_v57 = vpop.xlane.xlu0 %284 }
 0x34e   :  { %3184 = vrcp.f32 %v285_v57 }
 0x34f   :  { %v282_v58 = vpop.xlane.xlu1 %281 }
 0x350   :  { %3186 = vrcp.f32 %v282_v58 }
 0x353   :  { %v582_v1 = vpop.permute.xlu1 %581 }
 0x35b   :  { %v3185_v59 = vpop.eup %3184  ;;  %v485_v61 = vpop.xlane.xlu0 %484 }
 0x35c   :  { %v289_v63 = vmul.f32 %v3185_v59, %v3177_v44  ;;  %3188 = vrcp.f32 %v485_v61 }
 0x35d   :  { %v3187_v60 = vpop.eup %3186 }
 0x35e   :  { %v287_v62 = vmul.f32 %v3187_v60, %v3179_v47 }
 0x35f   :  { %v584_v0 = vpop.permute.xlu0 %583 }
 0x360   :  { %2964 = vmatprep.mubr.msk.f32.mxu0 %vm267_vm2, %v287_v62 }
 0x361   :  { %2965 = vmatmul.mubr.msk.f32.vlgmr.msra.gmra.mxu0 %vm267_vm2, %v289_v63 }
 0x362   :  { %2975 = vmatpush3.msra.mxu0 %v493_v48 }
 0x363   :  { %2976 = vmatprep.subr.mxu0 %v491_v56  ;;  %v578_v13 = vpop.permute.xlu0 %577 }
 0x364   :  { %2977 = vmatpush3.msra.mxu0 %v491_v56 }
 0x365   :  { %2981 = vmatprep.subr.msk.mxu0 %vm181_vm1, %v584_v0 }
 0x369   :  { %v3189_v4 = vpop.eup %3188 }
 0x36a   :  { %v489_v9 = vmul.f32 %v3189_v4, %v3181_v50 }
 0x384   :  { %v482_v3 = vpop.xlane.xlu1 %481 }
 0x385   :  { %3190 = vrcp.f32 %v482_v3 }
 0x388   :  { %v580_v14 = vpop.permute.xlu1 %579 }
 0x392   :  { %v3191_v6 = vpop.eup %3190 }
 0x393   :  { %v487_v7 = vmul.f32 %v3191_v6, %v3183_v54 }
 0x395   :  { %2978 = vmatprep.mubr.msk.f32.mxu0 %vm267_vm2, %v487_v7 }
 0x396   :  { %2979 = vmatmul.mubr.msk.f32.vlgmr.msra.gmra.mxu0 %vm267_vm2, %v489_v9 }
 0x397   :  { %2982 = vmatpush3.xpose.msk.msra.mxu0 %vm181_vm1, %v584_v0  ;;  %2985 = vmatprep.mubr.msk.f32.mxu0 %vm181_vm1, %v578_v13 }
 0x398   :  { %2983 = vmatprep.subr.msk.mxu0 %vm181_vm1, %v582_v1 }
 0x39b   :  { %2984 = vmatpush3.xpose.msk.msra.mxu0 %vm181_vm1, %v582_v1 }
 0x39e   :  { %2986 = vmatmul.mubr.msk.f32.vlgmr.msra.gmra.mxu0 %vm181_vm1, %v580_v14  ;;  %v1010_v14 = vld [vmem:[%s3929_s4 + $0x10] sm:$0xff] }
 0x421   :  { %v3530_v15 = vpop.f32.mrf.mxu0 }
 0x423   :  { %v3532_v16 = vpop.f32.mrf.mxu0 }
 0x456   :  { %v3534_v17 = vpop.f32.mrf.mxu0 }
 0x458   :  { %v3536_v18 = vpop.f32.mrf.mxu0 }
 0x45e   :  { %v2987_v20 = vpop.f32.mrf.mxu0 }
 0x45f   :  { %v665_v22 = vadd.f32 %v2987_v20, %v3488_v19 }
 0x460   :  { %v659_v23 = vpop.f32.mrf.mxu0 }
 0x461   :  { %v660_v24 = vadd.f32 %v659_v23, %v3490_v21  ;;  %v671_v25 = vsel %vm267_vm2, %v665_v22, -inf }
 0x462   :  { %672 = vmax.xlane.f32.xlu1 %v671_v25 }
 0x463   :  { %v668_v26 = vsel %vm267_vm2, %v660_v24, -inf }
 0x464   :  { %669 = vmax.xlane.f32.xlu0 %v668_v26 }
 0x473   :  { %692 = vrot.lane.b32.xlu1 %v3452_v8, %s3335_s25 }
 0x477   :  { %783 = vrot.lane.b32.xlu1 %v3452_v8, %s3336_s26 }
 0x47b   :  { %781 = vrot.lane.b32.xlu1 %v3454_v10, %s3336_s26 }
 0x47f   :  { %779 = vrot.lane.b32.xlu1 %v3470_v12, %s3337_s27 }
 0x4eb   :  { %v673_v27 = vpop.xlane.xlu1 %672 }
 0x4ec   :  { %v675_v28 = vsub.f32 %v665_v22, %v673_v27 }
 0x4ed   :  { %v670_v29 = vpop.xlane.xlu0 %669 }
 0x4ee   :  { %v678_v30 = vmul.f32 1.442695, %v675_v28  ;;  %v674_v31 = vsub.f32 %v660_v24, %v670_v29 }
 0x4ef   :  { %v693_v32 = vpop.permute.xlu1 %692 }
 0x4f0   :  { %3192 = vpow2.f32 %v678_v30  ;;  %v676_v33 = vmul.f32 1.442695, %v674_v31  ;;  %2988 = vmatprep.subr.mxu1 %v693_v32 }
 0x4f1   :  { %2989 = vmatpush3.msra.mxu1 %v693_v32 }
 0x4f2   :  { %3194 = vpow2.f32 %v676_v33 }
 0x4f3   :  { %v784_v40 = vpop.permute.xlu1 %783 }
 0x4fd   :  { %v3193_v34 = vpop.eup %3192 }
 0x4fe   :  { %v683_v35 = vsel %vm267_vm2, %v3193_v34, 0.0 }
 0x4ff   :  { %v3195_v36 = vpop.eup %3194  ;;  %684 = vadd.xlane.f32.xlu0 %v683_v35 }
 0x500   :  { %v680_v37 = vsel %vm267_vm2, %v3195_v36, 0.0 }
 0x503   :  { %681 = vadd.xlane.f32.xlu0 %v680_v37 }
 0x519   :  { %690 = vrot.lane.b32.xlu0 %v3454_v10, %s3335_s25 }
 0x51d   :  { %777 = vrot.lane.b32.xlu0 %v3461_v11, %s3337_s27  ;;  %v782_v11 = vpop.permute.xlu1 %781 }
 0x521   :  { %v780_v46 = vpop.permute.xlu1 %779 }
 0x588   :  { %v685_v12 = vpop.xlane.xlu0 %684 }
 0x589   :  { %3196 = vrcp.f32 %v685_v12 }
 0x58c   :  { %v682_v38 = vpop.xlane.xlu0 %681 }
 0x58d   :  { %3198 = vrcp.f32 %v682_v38 }
 0x590   :  { %v691_v39 = vpop.permute.xlu0 %690 }
 0x591   :  { %2990 = vmatprep.subr.mxu1 %v691_v39 }
 0x592   :  { %2991 = vmatpush3.msra.mxu1 %v691_v39 }
 0x593   :  { %2995 = vmatprep.subr.msk.mxu1 %vm181_vm1, %v784_v40 }
 0x594   :  { %v778_v45 = vpop.permute.xlu0 %777 }
 0x596   :  { %v3197_v41 = vpop.eup %3196 }
 0x597   :  { %v689_v44 = vmul.f32 %v3197_v41, %v3193_v34 }
 0x59a   :  { %v3199_v42 = vpop.eup %3198 }
 0x59b   :  { %v687_v43 = vmul.f32 %v3199_v42, %v3195_v36 }
 0x59d   :  { %2992 = vmatprep.mubr.msk.f32.mxu1 %vm267_vm2, %v687_v43 }
 0x59e   :  { %2993 = vmatmul.mubr.msk.f32.vlgmr.msra.gmra.mxu1 %vm267_vm2, %v689_v44 }
 0x59f   :  { %2996 = vmatpush3.xpose.msk.msra.mxu1 %vm181_vm1, %v784_v40  ;;  %2999 = vmatprep.mubr.msk.f32.mxu1 %vm181_vm1, %v778_v45 }
 0x5a0   :  { %2997 = vmatprep.subr.msk.mxu1 %vm181_vm1, %v782_v11 }
 0x5a3   :  { %2998 = vmatpush3.xpose.msk.msra.mxu1 %vm181_vm1, %v782_v11 }
 0x5a6   :  { %3000 = vmatmul.mubr.msk.f32.vlgmr.msra.gmra.mxu1 %vm181_vm1, %v780_v46 }
 0x65e   :  { %v2994_v47 = vpop.f32.mrf.mxu1 }
 0x660   :  { %v768_v48 = vpop.f32.mrf.mxu1 }
 0x666   :  { %v3001_v49 = vpop.f32.mrf.mxu1 }
 0x667   :  { %v865_v50 = vadd.f32 %v3001_v49, %v3488_v19  ;;  %v1149_v49 = vld [vmem:[%s3933_s8 + $0x10] sm:$0xff] }
 0x668   :  { %v859_v51 = vpop.f32.mrf.mxu1 }
 0x669   :  { %v860_v52 = vadd.f32 %v859_v51, %v3490_v21  ;;  %v871_v53 = vsel %vm267_vm2, %v865_v50, -inf  ;;  %v1147_v51 = vld [vmem:[%s3933_s8] sm:$0xff] }
 0x66a   :  { %872 = vmax.xlane.f32.xlu1 %v871_v53  ;;  %v1247_v53 = vld [vmem:[%s3935_s10 + $0x30] sm:$0xff] }
 0x66b   :  { %v868_v54 = vsel %vm267_vm2, %v860_v52, -inf }
 0x66c   :  { %869 = vmax.xlane.f32.xlu0 %v868_v54  ;;  %v1246_v54 = vld [vmem:[%s3935_s10 + $0x28] sm:$0xff] }
 0x67b   :  { %892 = vrot.lane.b32.xlu1 %v3452_v8, %s3945_s28 }
 0x67f   :  { %979 = vrot.lane.b32.xlu1 %v3536_v18, %s3943_s17  ;;  %v1008_v18 = vld [vmem:[%s3929_s4] sm:$0xff] }
 0x683   :  { %981 = vrot.lane.b32.xlu1 %v3534_v17, %s3943_s17  ;;  %v1009_v17 = vld [vmem:[%s3929_s4 + $0x8] sm:$0xff] }
 0x687   :  { %989 = vrot.lane.b32.xlu1 %v2994_v47, %s3941_s29 }
 0x6f3   :  { %v873_v55 = vpop.xlane.xlu1 %872 }
 0x6f4   :  { %v875_v56 = vsub.f32 %v865_v50, %v873_v55  ;;  %v1148_v50 = vld [vmem:[%s3933_s8 + $0x8] sm:$0xff]  ;;  %v1245_v55 = vld [vmem:[%s3935_s10 + $0x20] sm:$0xff] }
 0x6f5   :  { %v870_v57 = vpop.xlane.xlu0 %869 }
 0x6f6   :  { %v878_v58 = vmul.f32 1.442695, %v875_v56  ;;  %v874_v59 = vsub.f32 %v860_v52, %v870_v57  ;;  %v1248_v52 = vld [vmem:[%s3935_s10 + $0x38] sm:$0xff] }
 0x6f7   :  { %v893_v60 = vpop.permute.xlu1 %892 }
 0x6f8   :  { %3200 = vpow2.f32 %v878_v58  ;;  %v876_v61 = vmul.f32 1.442695, %v874_v59  ;;  %3002 = vmatprep.subr.mxu0 %v893_v60 }
 0x6f9   :  { %3003 = vmatpush3.msra.mxu0 %v893_v60 }
 0x6fa   :  { %3202 = vpow2.f32 %v876_v61 }
 0x6fb   :  { %v980_v23 = vpop.permute.xlu1 %979 }
 0x6fc   :  { %v1001_v27 = vsel %vm181_vm1, %v3532_v16, %v980_v23  ;;  %v2741_v16 = vld [vmem:[%s3930_s5] ss:$0 sm:$0xff] }
 0x6ff   :  { %v982_v24 = vpop.permute.xlu1 %981 }
 0x700   :  { %v1002_v29 = vsel %vm181_vm1, %v3530_v15, %v982_v24 }
 0x703   :  { %v990_v25 = vpop.permute.xlu1 %989 }
 0x704   :  { %v1004_v32 = vsel %vm267_vm2, %v1002_v29, %v990_v25 }
 0x705   :  { %v3201_v8 = vpop.eup %3200 }
 0x706   :  { %v883_v62 = vsel %vm267_vm2, %v3201_v8, 0.0 }
 0x707   :  { %v3203_v63 = vpop.eup %3202  ;;  %884 = vadd.xlane.f32.xlu0 %v883_v62  ;;  %v2744_v62 = vld [vmem:[%s3931_s6] ss:$0 sm:$0xff] }
 0x708   :  { %v880_v0 = vsel %vm267_vm2, %v3203_v63, 0.0 }
 0x70b   :  { %881 = vadd.xlane.f32.xlu0 %v880_v0  ;;  %v2745_v0 = vld [vmem:[%s3932_s7] ss:$0 sm:$0xff] }
 0x721   :  { %890 = vrot.lane.b32.xlu0 %v3454_v10, %s3945_s28  ;;  %v1011_v10 = vld [vmem:[%s3929_s4 + $0x18] sm:$0xff] }
 0x725   :  { %987 = vrot.lane.b32.xlu0 %v768_v48, %s3941_s29 }
 0x790   :  { %v885_v1 = vpop.xlane.xlu0 %884 }
 0x791   :  { %3204 = vrcp.f32 %v885_v1 }
 0x794   :  { %v882_v3 = vpop.xlane.xlu0 %881 }
 0x795   :  { %3206 = vrcp.f32 %v882_v3 }
 0x798   :  { %v891_v4 = vpop.permute.xlu0 %890 }
 0x799   :  { %3004 = vmatprep.subr.mxu0 %v891_v4 }
 0x79a   :  { %3005 = vmatpush3.msra.mxu0 %v891_v4 }
 0x79b   :  { %3009 = vmatprep.subr.mxu0 %v1011_v10 }
 0x79c   :  { %v988_v26 = vpop.permute.xlu0 %987 }
 0x79d   :  { %v1003_v30 = vsel %vm267_vm2, %v1001_v27, %v988_v26  ;;  %v2749_v27 = vld [vmem:[%s3936_s11] ss:$0 sm:$0xff] }
 0x79e   :  { %v3205_v6 = vpop.eup %3204 }
 0x79f   :  { %v889_v13 = vmul.f32 %v3205_v6, %v3201_v8 }
 0x7a2   :  { %v3207_v7 = vpop.eup %3206 }
 0x7a3   :  { %v887_v9 = vmul.f32 %v3207_v7, %v3203_v63 }
 0x7a5   :  { %3006 = vmatprep.mubr.msk.f32.mxu0 %vm267_vm2, %v887_v9 }
 0x7a6   :  { %3007 = vmatmul.mubr.msk.f32.vlgmr.msra.gmra.mxu0 %vm267_vm2, %v889_v13  ;;  %v1244_v13 = vld [vmem:[%s3935_s10 + $0x18] sm:$0xff] }
 0x7a7   :  { %3010 = vmatpush3.msra.mxu0 %v1011_v10  ;;  %v1243_v10 = vld [vmem:[%s3935_s10 + $0x10] sm:$0xff] }
 0x7a8   :  { %3011 = vmatprep.subr.mxu0 %v1010_v14 }
 0x7a9   :  { %3012 = vmatpush3.msra.mxu0 %v1010_v14  ;;  %v1242_v14 = vld [vmem:[%s3935_s10 + $0x8] sm:$0xff] }
 0x7aa   :  { %3013 = vmatprep.subr.mxu0 %v1009_v17 }
 0x7ab   :  { %3014 = vmatpush3.msra.mxu0 %v1009_v17  ;;  %v1241_v17 = vld [vmem:[%s3935_s10] sm:$0xff] }
 0x7ac   :  { %3015 = vmatprep.subr.mxu0 %v1008_v18 }
 0x7ad   :  { %3016 = vmatpush3.msra.mxu0 %v1008_v18  ;;  %v2746_v18 = vld [vmem:[%s3934_s9] ss:$0 sm:$0xff] }
 0x7ae   :  { %3031 = vmatprep.subr.mxu0 %v1248_v52 }
 0x866   :  { %v3008_v20 = vpop.f32.mrf.mxu0 }
 0x867   :  { %997 = vrot.lane.b32.xlu1 %v3008_v20, %s3947_s1 }
 0x868   :  { %v968_v22 = vpop.f32.mrf.mxu0 }
 0x869   :  { %995 = vrot.lane.b32.xlu0 %v968_v22, %s3947_s1 }
 0x8d9   :  { %v998_v28 = vpop.permute.xlu1 %997 }
 0x8da   :  { %v1007_v34 = vsel %vm1005_vm3, %v1004_v32, %v998_v28 }
 0x8db   :  { %v996_v31 = vpop.permute.xlu0 %995 }
 0x8dc   :  { %v1006_v33 = vsel %vm1005_vm3, %v1003_v30, %v996_v31 }
 0x8dd   :  { %3017 = vmatprep.mubr.msk.f32.mxu0 %vm91_vm0, %v1006_v33 }
 0x8de   :  { %3018 = vmatmul.mubr.msk.f32.vlgmr.msra.gmra.mxu0 %vm91_vm0, %v1007_v34 }
 0x8df   :  { %3032 = vmatpush3.msra.mxu0 %v1248_v52 }
 0x8e0   :  { %3033 = vmatprep.subr.mxu0 %v1247_v53 }
 0x8e1   :  { %3034 = vmatpush3.msra.mxu0 %v1247_v53 }
 0x8e2   :  { %3035 = vmatprep.subr.mxu0 %v1246_v54 }
 0x8e3   :  { %3036 = vmatpush3.msra.mxu0 %v1246_v54 }
 0x8e4   :  { %3037 = vmatprep.subr.mxu0 %v1245_v55 }
 0x8e5   :  { %3038 = vmatpush3.msra.mxu0 %v1245_v55 }
 0x8e6   :  { %3039 = vmatprep.subr.mxu0 %v1244_v13 }
 0x8e7   :  { %3040 = vmatpush3.msra.mxu0 %v1244_v13 }
 0x8e8   :  { %3041 = vmatprep.subr.mxu0 %v1243_v10 }
 0x8e9   :  { %3042 = vmatpush3.msra.mxu0 %v1243_v10 }
 0x8ea   :  { %3043 = vmatprep.subr.mxu0 %v1242_v14 }
 0x8eb   :  { %3044 = vmatpush3.msra.mxu0 %v1242_v14 }
 0x8ec   :  { %3045 = vmatprep.subr.mxu0 %v1241_v17 }
 0x8ed   :  { %3046 = vmatpush3.msra.mxu0 %v1241_v17 }
 0x99e   :  { %v3019_v35 = vpop.f32.mrf.mxu0 }
 0x99f   :  { %v1097_v36 = vadd.f32 %v3019_v35, %v2741_v16 }
 0x9a0   :  { %v1091_v15 = vpop.f32.mrf.mxu0 }
 0x9a1   :  { %v1092_v37 = vadd.f32 %v2741_v16, %v1091_v15  ;;  %v1101_v12 = vadd.f32 %v1097_v36, %v3445_v5 }
 0x9a3   :  { %v1107_v38 = vsel %vm91_vm0, %v1101_v12, 0.0  ;;  %v1100_v39 = vadd.f32 %v1092_v37, %v3435_v2  ;;  %v1150_v2 = vld [vmem:[%s3933_s8 + $0x18] sm:$0xff] }
 0x9a4   :  { %1108 = vadd.xlane.f32.xlu1 %v1107_v38  ;;  %3020 = vmatprep.subr.mxu1 %v1150_v2 }
 0x9a5   :  { %v1104_v40 = vsel %vm91_vm0, %v1100_v39, 0.0  ;;  %3021 = vmatpush3.msra.mxu1 %v1150_v2 }
 0x9a6   :  { %1105 = vadd.xlane.f32.xlu0 %v1104_v40  ;;  %3022 = vmatprep.subr.mxu1 %v1149_v49 }
 0x9a7   :  { %3023 = vmatpush3.msra.mxu1 %v1149_v49 }
 0x9a8   :  { %3024 = vmatprep.subr.mxu1 %v1148_v50 }
 0x9a9   :  { %3025 = vmatpush3.msra.mxu1 %v1148_v50 }
 0x9aa   :  { %3026 = vmatprep.subr.mxu1 %v1147_v51 }
 0x9ab   :  { %3027 = vmatpush3.msra.mxu1 %v1147_v51  ;;  %v2752_v51 = vld [vmem:[%s3937_s12] ss:$0 sm:$0xff] }
 0xa2d   :  { %v1109_v41 = vpop.xlane.xlu1 %1108 }
 0xa2e   :  { %v1112_v42 = vmul.f32 0.03125, %v1109_v41 }
 0xa2f   :  { %v1106_v43 = vpop.xlane.xlu0 %1105 }
 0xa30   :  { %v1111_v44 = vmul.f32 0.03125, %v1106_v43  ;;  %v1114_v45 = vsub.f32 %v1101_v12, %v1112_v42  ;;  %v2757_v43 = vld [vmem:[%s3927_s2 + $0x38] sm:$0xff] }
 0xa31   :  { %3050 = vmatprep.subr.mxu1 %v2757_v43 }
 0xa32   :  { %v1113_v11 = vsub.f32 %v1100_v39, %v1111_v44  ;;  %v1116_v48 = vmul.f32 %v1114_v45, %v1114_v45  ;;  %v2756_v44 = vld [vmem:[%s3927_s2 + $0x30] sm:$0xff] }
 0xa34   :  { %v1115_v46 = vmul.f32 %v1113_v11, %v1113_v11  ;;  %v1120_v5 = vsel %vm91_vm0, %v1116_v48, 0.0 }
 0xa36   :  { %v1117_v47 = vsel %vm91_vm0, %v1115_v46, 0.0 }
 0xa37   :  { %1118 = vadd.xlane.f32.xlu0 %v1117_v47 }
 0xa3b   :  { %1121 = vadd.xlane.f32.xlu0 %v1120_v5 }
 0xac0   :  { %v1119_v56 = vpop.xlane.xlu0 %1118 }
 0xac1   :  { %v1123_v57 = vmul.f32 0.03125, %v1119_v56  ;;  %v2753_v56 = vld [vmem:[%s3938_s13] ss:$0 sm:$0xff] }
 0xac3   :  { %v1125_v58 = vadd.f32 1e-05, %v1123_v57 }
 0xac4   :  { %v1122_v59 = vpop.xlane.xlu0 %1121 }
 0xac5   :  { %3208 = vrsqrt.f32 %v1125_v58  ;;  %v1124_v60 = vmul.f32 0.03125, %v1122_v59 }
 0xac7   :  { %v1126_v61 = vadd.f32 1e-05, %v1124_v60  ;;  %v2759_v60 = vld [vmem:[%s3928_s3 + $0x1] ss:$0 sm:$0xff]  ;;  %s3949_s3 = smov 40  }
 0xac9   :  { %3210 = vrsqrt.f32 %v1126_v61 }
 0xad2   :  { %v3209_v8 = vpop.eup %3208 }
 0xad3   :  { %v1129_v63 = vmul.f32 %v3209_v8, %v1113_v11  ;;  %v2754_v11 = vld [vmem:[%s3927_s2 + $0x20] sm:$0xff] }
 0xad5   :  { %v1137_v1 = vmul.f32 %v2744_v62, %v1129_v63 }
 0xad6   :  { %v3211_v3 = vpop.eup %3210 }
 0xad7   :  { %v1130_v4 = vmul.f32 %v3211_v3, %v1114_v45  ;;  %v1145_v6 = vadd.f32 %v2745_v0, %v1137_v1  ;;  %v2755_v45 = vld [vmem:[%s3927_s2 + $0x28] sm:$0xff] }
 0xad9   :  { %v1138_v7 = vmul.f32 %v2744_v62, %v1130_v4  ;;  %3028 = vmatprep.mubr.msk.f32.mxu1 %vm91_vm0, %v1145_v6 }
 0xadb   :  { %v1146_v9 = vadd.f32 %v2745_v0, %v1138_v7 }
 0xadd   :  { %3029 = vmatmul.mubr.msk.f32.vlgmr.msra.gmra.mxu1 %vm91_vm0, %v1146_v9 }
 0xade   :  { %3051 = vmatpush3.msra.mxu1 %v2757_v43 }
 0xadf   :  { %3052 = vmatprep.subr.mxu1 %v2756_v44 }
 0xae0   :  { %3053 = vmatpush3.msra.mxu1 %v2756_v44 }
 0xae1   :  { %3054 = vmatprep.subr.mxu1 %v2755_v45 }
 0xae2   :  { %3055 = vmatpush3.msra.mxu1 %v2755_v45 }
 0xae3   :  { %3056 = vmatprep.subr.mxu1 %v2754_v11 }
 0xae4   :  { %3057 = vmatpush3.msra.mxu1 %v2754_v11 }
 0xb9d   :  { %v3030_v20 = vpop.f32.mrf.mxu1 }
 0xb9e   :  { %v1236_v22 = vadd.f32 %v3030_v20, %v2746_v18 }
 0xb9f   :  { %v1230_v23 = vpop.f32.mrf.mxu1 }
 0xba0   :  { %v1231_v24 = vadd.f32 %v2746_v18, %v1230_v23  ;;  %v1240_v26 = vmax.f32 %v1236_v22, 0.0 }
 0xba2   :  { %v1239_v25 = vmax.f32 %v1231_v24, 0.0 }
 0xba4   :  { %3047 = vmatprep.mubr.msk.f32.mxu0 %vm1256_vm4, %v1239_v25 }
 0xba5   :  { %3048 = vmatmul.mubr.msk.f32.vlgmr.msra.gmra.mxu0 %vm1256_vm4, %v1240_v26 }
 0xc65   :  { %v3049_v28 = vpop.f32.mrf.mxu0 }
 0xc66   :  { %v1335_v29 = vadd.f32 %v3049_v28, %v2749_v27 }
 0xc67   :  { %v1329_v30 = vpop.f32.mrf.mxu0 }
 0xc68   :  { %v1330_v31 = vadd.f32 %v2749_v27, %v1329_v30  ;;  %v1339_v32 = vadd.f32 %v1335_v29, %v1146_v9 }
 0xc6a   :  { %v1345_v33 = vsel %vm91_vm0, %v1339_v32, 0.0  ;;  %v1338_v34 = vadd.f32 %v1330_v31, %v1145_v6 }
 0xc6b   :  { %1346 = vadd.xlane.f32.xlu0 %v1345_v33 }
 0xc6c   :  { %v1342_v16 = vsel %vm91_vm0, %v1338_v34, 0.0 }
 0xc6d   :  { %1343 = vadd.xlane.f32.xlu1 %v1342_v16 }
 0xcf4   :  { %v1347_v35 = vpop.xlane.xlu0 %1346 }
 0xcf5   :  { %v1349_v36 = vmul.f32 0.03125, %v1347_v35 }
 0xcf6   :  { %v1344_v15 = vpop.xlane.xlu1 %1343 }
 0xcf7   :  { %v1351_v37 = vsub.f32 %v1339_v32, %v1349_v36  ;;  %v1348_v12 = vmul.f32 0.03125, %v1344_v15 }
 0xcf9   :  { %v1350_v38 = vsub.f32 %v1338_v34, %v1348_v12  ;;  %v1353_v39 = vmul.f32 %v1351_v37, %v1351_v37 }
 0xcfb   :  { %v1357_v40 = vsel %vm91_vm0, %v1353_v39, 0.0  ;;  %v1352_v41 = vmul.f32 %v1350_v38, %v1350_v38 }
 0xcfc   :  { %1358 = vadd.xlane.f32.xlu0 %v1357_v40 }
 0xcfd   :  { %v1354_v42 = vsel %vm91_vm0, %v1352_v41, 0.0 }
 0xcfe   :  { %1355 = vadd.xlane.f32.xlu1 %v1354_v42 }
 0xd85   :  { %v1359_v46 = vpop.xlane.xlu0 %1358 }
 0xd86   :  { %v1361_v47 = vmul.f32 0.03125, %v1359_v46 }
 0xd87   :  { %v1356_v48 = vpop.xlane.xlu1 %1355 }
 0xd88   :  { %v1363_v5 = vadd.f32 1e-05, %v1361_v47  ;;  %v1360_v2 = vmul.f32 0.03125, %v1356_v48 }
 0xd8a   :  { %3212 = vrsqrt.f32 %v1363_v5  ;;  %v1362_v49 = vadd.f32 1e-05, %v1360_v2 }
 0xd8c   :  { %3214 = vrsqrt.f32 %v1362_v49 }
 0xd97   :  { %v3213_v50 = vpop.eup %3212 }
 0xd98   :  { %v1367_v52 = vmul.f32 %v3213_v50, %v1351_v37 }
 0xd99   :  { %v3215_v53 = vpop.eup %3214 }
 0xd9a   :  { %v1366_v54 = vmul.f32 %v3215_v53, %v1350_v38  ;;  %v1375_v55 = vmul.f32 %v2752_v51, %v1367_v52 }
 0xd9c   :  { %v1374_v57 = vmul.f32 %v2752_v51, %v1366_v54  ;;  %v3691_v59 = vadd.f32 %v2753_v56, %v1375_v55 }
 0xd9e   :  { %v3689_v58 = vadd.f32 %v2753_v56, %v1374_v57 }
 0xda0   :  { %3058 = vmatprep.mubr.msk.f32.mxu1 %vm91_vm0, %v3689_v58 }
 0xda1   :  { %3059 = vmatmul.mubr.msk.f32.vlgmr.msra.gmra.mxu1 %vm91_vm0, %v3691_v59 }
 0xe61   :  { %v3060_v61 = vpop.f32.mrf.mxu1 }
 0xe62   :  { %v3700_v8 = vadd.f32 %v3060_v61, %v2759_v60 }
 0xe63   :  { %v1469_v62 = vpop.f32.mrf.mxu1 }
 0xe64   :  { %v3702_v63 = vadd.f32 %v2759_v60, %v1469_v62  ;;  %1484 = vrot.lane.b32.xlu1 %v3700_v8, %s3329_s20  ;;  %v3720_v1 = vmul.f32 0.35355338, %v3700_v8 }
 0xe66   :  { %1482 = vrot.lane.b32.xlu0 %v3702_v63, %s3329_s20  ;;  %v3709_v0 = vmul.f32 0.35355338, %v3702_v63  ;;  %s3951_s20 = smov 16  }
 0xe68   :  { %1686 = vrot.lane.b32.xlu1 %v3700_v8, %s3328_s19  ;;  %3065 = vmatprep.mubr.msk.f32.mxu1 %vm181_vm1, %v3709_v0 }
 0xe6a   :  { %1680 = vrot.lane.b32.xlu0 %v3709_v0, %s3330_s21 }
 0xe6c   :  { %1684 = vrot.lane.b32.xlu1 %v3702_v63, %s3328_s19  ;;  %s3950_s19 = smov 8  }
 0xe70   :  { %1682 = vrot.lane.b32.xlu1 %v3720_v1, %s3330_s21 }
 0xed6   :  { %v1485_v3 = vpop.permute.xlu1 %1484 }
 0xed7   :  { %3061 = vmatprep.subr.msk.mxu1 %vm181_vm1, %v1485_v3 }
 0xed8   :  { %3062 = vmatpush3.xpose.msk.msra.mxu1 %vm181_vm1, %v1485_v3  ;;  %v1483_v4 = vpop.permute.xlu0 %1482 }
 0xed9   :  { %3063 = vmatprep.subr.msk.mxu1 %vm181_vm1, %v1483_v4 }
 0xeda   :  { %v1687_v6 = vpop.permute.xlu1 %1686 }
 0xedc   :  { %3064 = vmatpush3.xpose.msk.msra.mxu1 %vm181_vm1, %v1483_v4  ;;  %v1681_v7 = vpop.permute.xlu0 %1680 }
 0xedd   :  { %3075 = vmatprep.subr.msk.mxu1 %vm181_vm1, %v1687_v6 }
 0xede   :  { %v1685_v9 = vpop.permute.xlu1 %1684 }
 0xedf   :  { %3066 = vmatmul.mubr.msk.f32.vlgmr.msra.gmra.mxu1 %vm181_vm1, %v3720_v1 }
 0xee0   :  { %3076 = vmatpush3.xpose.msk.msra.mxu1 %vm181_vm1, %v1687_v6  ;;  %3079 = vmatprep.mubr.msk.f32.mxu1 %vm181_vm1, %v1681_v7 }
 0xee1   :  { %3077 = vmatprep.subr.msk.mxu1 %vm181_vm1, %v1685_v9 }
 0xee2   :  { %v1683_v13 = vpop.permute.xlu1 %1682 }
 0xee4   :  { %3078 = vmatpush3.xpose.msk.msra.mxu1 %vm181_vm1, %v1685_v9 }
 0xee7   :  { %3080 = vmatmul.mubr.msk.f32.vlgmr.msra.gmra.mxu1 %vm181_vm1, %v1683_v13  ;;  %v3256_v13 = vld [vmem:[#allocation5 + $0x8] sm:$0xff] }
 0xf9f   :  { %v3067_v10 = vpop.f32.mrf.mxu1 }
 0xfa0   :  { %v1568_v14 = vadd.f32 %v3067_v10, %v3488_v19 }
 0xfa1   :  { %v1562_v17 = vpop.f32.mrf.mxu1 }
 0xfa2   :  { %v1563_v18 = vadd.f32 %v1562_v17, %v3490_v21  ;;  %v1574_v20 = vsel %vm267_vm2, %v1568_v14, -inf  ;;  %v3257_v17 = vld [vmem:[#allocation5] sm:$0xff] }
 0xfa3   :  { %1575 = vmax.xlane.f32.xlu1 %v1574_v20 }
 0xfa4   :  { %v1571_v22 = vsel %vm267_vm2, %v1563_v18, -inf }
 0xfa5   :  { %1572 = vmax.xlane.f32.xlu0 %v1571_v22 }
 0xfa7   :  { %v3081_v23 = vpop.f32.mrf.mxu1 }
 0xfa8   :  { %v1768_v26 = vadd.f32 %v3081_v23, %v3488_v19 }
 0xfa9   :  { %v1762_v24 = vpop.f32.mrf.mxu1 }
 0xfaa   :  { %v1763_v25 = vadd.f32 %v1762_v24, %v3490_v21  ;;  %v1774_v28 = vsel %vm267_vm2, %v1768_v26, -inf }
 0xfac   :  { %v1771_v27 = vsel %vm267_vm2, %v1763_v25, -inf }
 0xfad   :  { %1772 = vmax.xlane.f32.xlu0 %v1771_v27 }
 0xfb1   :  { %1775 = vmax.xlane.f32.xlu0 %v1774_v28 }
 0xfb4   :  { %1595 = vrot.lane.b32.xlu1 %v3700_v8, %s3331_s22 }
 0xfb8   :  { %1795 = vrot.lane.b32.xlu1 %v3700_v8, %s3332_s23 }
 0xfbc   :  { %1793 = vrot.lane.b32.xlu1 %v3702_v63, %s3332_s23 }
 0xfc7   :  { %1593 = vrot.lane.b32.xlu0 %v3702_v63, %s3331_s22 }
0x102c   :  { %v1576_v21 = vpop.xlane.xlu1 %1575 }
0x102d   :  { %v1578_v19 = vsub.f32 %v1568_v14, %v1576_v21 }
0x102e   :  { %v1573_v29 = vpop.xlane.xlu0 %1572 }
0x102f   :  { %v1581_v30 = vmul.f32 1.442695, %v1578_v19  ;;  %v1577_v31 = vsub.f32 %v1563_v18, %v1573_v29 }
0x1030   :  { %v1596_v32 = vpop.permute.xlu1 %1595 }
0x1031   :  { %3216 = vpow2.f32 %v1581_v30  ;;  %v1579_v33 = vmul.f32 1.442695, %v1577_v31  ;;  %3068 = vmatprep.subr.mxu0 %v1596_v32 }
0x1032   :  { %3069 = vmatpush3.msra.mxu0 %v1596_v32 }
0x1033   :  { %3218 = vpow2.f32 %v1579_v33 }
0x1034   :  { %v1796_v39 = vpop.permute.xlu1 %1795 }
0x1036   :  { %v1773_v34 = vpop.xlane.xlu0 %1772 }
0x1037   :  { %v1777_v43 = vsub.f32 %v1763_v25, %v1773_v34 }
0x1038   :  { %v1794_v46 = vpop.permute.xlu1 %1793 }
0x1039   :  { %v1779_v44 = vmul.f32 1.442695, %v1777_v43 }
0x103a   :  { %v1776_v16 = vpop.xlane.xlu0 %1775 }
0x103b   :  { %v1778_v35 = vsub.f32 %v1768_v26, %v1776_v16 }
0x103d   :  { %v1781_v36 = vmul.f32 1.442695, %v1778_v35 }
0x103e   :  { %v3217_v15 = vpop.eup %3216  ;;  %v1594_v37 = vpop.permute.xlu0 %1593 }
0x103f   :  { %3220 = vpow2.f32 %v1781_v36  ;;  %3070 = vmatprep.subr.mxu0 %v1594_v37  ;;  %v1586_v12 = vsel %vm267_vm2, %v3217_v15, 0.0 }
0x1040   :  { %v3219_v38 = vpop.eup %3218  ;;  %1587 = vadd.xlane.f32.xlu0 %v1586_v12  ;;  %3071 = vmatpush3.msra.mxu0 %v1594_v37  ;;  %3222 = vpow2.f32 %v1779_v44 }
0x1041   :  { %3082 = vmatprep.subr.mxu0 %v1796_v39  ;;  %v1583_v40 = vsel %vm267_vm2, %v3219_v38, 0.0 }
0x1042   :  { %1584 = vadd.xlane.f32.xlu1 %v1583_v40 }
0x104c   :  { %v3221_v41 = vpop.eup %3220 }
0x104d   :  { %v1786_v42 = vsel %vm267_vm2, %v3221_v41, 0.0  ;;  %v3223_v45 = vpop.eup %3222 }
0x104e   :  { %1787 = vadd.xlane.f32.xlu0 %v1786_v42  ;;  %v1783_v11 = vsel %vm267_vm2, %v3223_v45, 0.0 }
0x1053   :  { %1884 = vrot.lane.b32.xlu1 %v3702_v63, %s3333_s24 }
0x1064   :  { %1886 = vrot.lane.b32.xlu0 %v3700_v8, %s3333_s24 }
0x1068   :  { %1880 = vrot.lane.b32.xlu0 %v3709_v0, %s3334_s0 }
0x1077   :  { %1784 = vadd.xlane.f32.xlu1 %v1783_v11 }
0x1088   :  { %1882 = vrot.lane.b32.xlu1 %v3720_v1, %s3334_s0 }
0x10c9   :  { %v1588_v47 = vpop.xlane.xlu0 %1587 }
0x10ca   :  { %3224 = vrcp.f32 %v1588_v47 }
0x10cb   :  { %v1585_v48 = vpop.xlane.xlu1 %1584 }
0x10cc   :  { %3226 = vrcp.f32 %v1585_v48 }
0x10cf   :  { %v1885_v53 = vpop.permute.xlu1 %1884 }
0x10d7   :  { %v3225_v5 = vpop.eup %3224  ;;  %v1788_v49 = vpop.xlane.xlu0 %1787 }
0x10d8   :  { %v1592_v51 = vmul.f32 %v3225_v5, %v3217_v15  ;;  %3228 = vrcp.f32 %v1788_v49 }
0x10d9   :  { %v3227_v2 = vpop.eup %3226 }
0x10da   :  { %v1590_v50 = vmul.f32 %v3227_v2, %v3219_v38 }
0x10db   :  { %v1887_v52 = vpop.permute.xlu0 %1886 }
0x10dc   :  { %3072 = vmatprep.mubr.msk.f32.mxu0 %vm267_vm2, %v1590_v50 }
0x10dd   :  { %3073 = vmatmul.mubr.msk.f32.vlgmr.msra.gmra.mxu0 %vm267_vm2, %v1592_v51 }
0x10de   :  { %3083 = vmatpush3.msra.mxu0 %v1796_v39 }
0x10df   :  { %3084 = vmatprep.subr.mxu0 %v1794_v46  ;;  %v1881_v61 = vpop.permute.xlu0 %1880 }
0x10e0   :  { %3085 = vmatpush3.msra.mxu0 %v1794_v46 }
0x10e1   :  { %3089 = vmatprep.subr.msk.mxu0 %vm181_vm1, %v1887_v52 }
0x10e5   :  { %v3229_v55 = vpop.eup %3228 }
0x10e6   :  { %v1792_v60 = vmul.f32 %v3229_v55, %v3221_v41 }
0x1100   :  { %v1785_v54 = vpop.xlane.xlu1 %1784 }
0x1101   :  { %3230 = vrcp.f32 %v1785_v54 }
0x1104   :  { %v1883_v62 = vpop.permute.xlu1 %1882 }
0x110e   :  { %v3231_v56 = vpop.eup %3230 }
0x110f   :  { %v1790_v57 = vmul.f32 %v3231_v56, %v3223_v45 }
0x1111   :  { %3086 = vmatprep.mubr.msk.f32.mxu0 %vm267_vm2, %v1790_v57 }
0x1112   :  { %3087 = vmatmul.mubr.msk.f32.vlgmr.msra.gmra.mxu0 %vm267_vm2, %v1792_v60 }
0x1113   :  { %3090 = vmatpush3.xpose.msk.msra.mxu0 %vm181_vm1, %v1887_v52  ;;  %3093 = vmatprep.mubr.msk.f32.mxu0 %vm181_vm1, %v1881_v61 }
0x1114   :  { %3091 = vmatprep.subr.msk.mxu0 %vm181_vm1, %v1885_v53 }
0x1117   :  { %3092 = vmatpush3.xpose.msk.msra.mxu0 %vm181_vm1, %v1885_v53 }
0x111a   :  { %3094 = vmatmul.mubr.msk.f32.vlgmr.msra.gmra.mxu0 %vm181_vm1, %v1883_v62  ;;  %v2788_v62 = vld [vmem:[%s3929_s4 + $0x30] sm:$0xff] }
0x119d   :  { %v3774_v3 = vpop.f32.mrf.mxu0 }
0x119f   :  { %v3776_v4 = vpop.f32.mrf.mxu0 }
0x11d2   :  { %v3778_v6 = vpop.f32.mrf.mxu0 }
0x11d4   :  { %v3780_v7 = vpop.f32.mrf.mxu0 }
0x11da   :  { %v3095_v9 = vpop.f32.mrf.mxu0 }
0x11db   :  { %v1968_v10 = vadd.f32 %v3256_v13, %v3095_v9 }
0x11dc   :  { %v1962_v14 = vpop.f32.mrf.mxu0 }
0x11dd   :  { %v1963_v18 = vadd.f32 %v3257_v17, %v1962_v14  ;;  %v1974_v20 = vsel %vm267_vm2, %v1968_v10, -inf }
0x11de   :  { %1975 = vmax.xlane.f32.xlu1 %v1974_v20 }
0x11df   :  { %v1971_v22 = vsel %vm267_vm2, %v1963_v18, -inf }
0x11e0   :  { %1972 = vmax.xlane.f32.xlu0 %v1971_v22 }
0x11ef   :  { %1995 = vrot.lane.b32.xlu1 %v3700_v8, %s3335_s25 }
0x11f3   :  { %2086 = vrot.lane.b32.xlu1 %v3700_v8, %s3336_s26 }
0x11f7   :  { %2084 = vrot.lane.b32.xlu1 %v3702_v63, %s3336_s26 }
0x11fb   :  { %2082 = vrot.lane.b32.xlu1 %v3720_v1, %s3337_s27 }
0x1267   :  { %v1976_v23 = vpop.xlane.xlu1 %1975 }
0x1268   :  { %v1978_v24 = vsub.f32 %v1968_v10, %v1976_v23 }
0x1269   :  { %v1973_v25 = vpop.xlane.xlu0 %1972 }
0x126a   :  { %v1981_v26 = vmul.f32 1.442695, %v1978_v24  ;;  %v1977_v27 = vsub.f32 %v1963_v18, %v1973_v25 }
0x126b   :  { %v1996_v28 = vpop.permute.xlu1 %1995 }
0x126c   :  { %3232 = vpow2.f32 %v1981_v26  ;;  %v1979_v21 = vmul.f32 1.442695, %v1977_v27  ;;  %3096 = vmatprep.subr.mxu1 %v1996_v28 }
0x126d   :  { %3097 = vmatpush3.msra.mxu1 %v1996_v28 }
0x126e   :  { %3234 = vpow2.f32 %v1979_v21 }
0x126f   :  { %v2087_v34 = vpop.permute.xlu1 %2086 }
0x1279   :  { %v3233_v19 = vpop.eup %3232 }
0x127a   :  { %v1986_v29 = vsel %vm267_vm2, %v3233_v19, 0.0 }
0x127b   :  { %v3235_v30 = vpop.eup %3234  ;;  %1987 = vadd.xlane.f32.xlu0 %v1986_v29 }
0x127c   :  { %v1983_v31 = vsel %vm267_vm2, %v3235_v30, 0.0 }
0x127f   :  { %1984 = vadd.xlane.f32.xlu0 %v1983_v31 }
0x1295   :  { %1993 = vrot.lane.b32.xlu0 %v3702_v63, %s3335_s25 }
0x1299   :  { %2080 = vrot.lane.b32.xlu0 %v3709_v0, %s3337_s27  ;;  %v2085_v0 = vpop.permute.xlu1 %2084 }
0x129d   :  { %v2083_v12 = vpop.permute.xlu1 %2082 }
0x1304   :  { %v1988_v1 = vpop.xlane.xlu0 %1987 }
0x1305   :  { %3236 = vrcp.f32 %v1988_v1 }
0x1308   :  { %v1985_v32 = vpop.xlane.xlu0 %1984 }
0x1309   :  { %3238 = vrcp.f32 %v1985_v32 }
0x130c   :  { %v1994_v33 = vpop.permute.xlu0 %1993 }
0x130d   :  { %3098 = vmatprep.subr.mxu1 %v1994_v33 }
0x130e   :  { %3099 = vmatpush3.msra.mxu1 %v1994_v33 }
0x130f   :  { %3103 = vmatprep.subr.msk.mxu1 %vm181_vm1, %v2087_v34 }
0x1310   :  { %v2081_v37 = vpop.permute.xlu0 %2080 }
0x1312   :  { %v3237_v16 = vpop.eup %3236 }
0x1313   :  { %v1992_v15 = vmul.f32 %v3237_v16, %v3233_v19 }
0x1316   :  { %v3239_v35 = vpop.eup %3238 }
0x1317   :  { %v1990_v36 = vmul.f32 %v3239_v35, %v3235_v30 }
0x1319   :  { %3100 = vmatprep.mubr.msk.f32.mxu1 %vm267_vm2, %v1990_v36 }
0x131a   :  { %3101 = vmatmul.mubr.msk.f32.vlgmr.msra.gmra.mxu1 %vm267_vm2, %v1992_v15 }
0x131b   :  { %3104 = vmatpush3.xpose.msk.msra.mxu1 %vm181_vm1, %v2087_v34  ;;  %3107 = vmatprep.mubr.msk.f32.mxu1 %vm181_vm1, %v2081_v37 }
0x131c   :  { %3105 = vmatprep.subr.msk.mxu1 %vm181_vm1, %v2085_v0 }
0x131f   :  { %3106 = vmatpush3.xpose.msk.msra.mxu1 %vm181_vm1, %v2085_v0 }
0x1322   :  { %3108 = vmatmul.mubr.msk.f32.vlgmr.msra.gmra.mxu1 %vm181_vm1, %v2083_v12 }
0x13da   :  { %v3102_v38 = vpop.f32.mrf.mxu1 }
0x13dc   :  { %v2071_v39 = vpop.f32.mrf.mxu1 }
0x13e2   :  { %v3109_v40 = vpop.f32.mrf.mxu1 }
0x13e3   :  { %v2168_v41 = vadd.f32 %v3256_v13, %v3109_v40  ;;  %v2798_v40 = vld [vmem:[%s3933_s8 + $0x20] sm:$0xff] }
0x13e4   :  { %v2162_v42 = vpop.f32.mrf.mxu1 }
0x13e5   :  { %v2163_v43 = vadd.f32 %v3257_v17, %v2162_v42  ;;  %v2174_v44 = vsel %vm267_vm2, %v2168_v41, -inf  ;;  %v2812_v42 = vld [vmem:[%s3935_s10 + $0x70] sm:$0xff] }
0x13e6   :  { %2175 = vmax.xlane.f32.xlu1 %v2174_v44  ;;  %v2810_v44 = vld [vmem:[%s3935_s10 + $0x60] sm:$0xff] }
0x13e7   :  { %v2171_v45 = vsel %vm267_vm2, %v2163_v43, -inf }
0x13e8   :  { %2172 = vmax.xlane.f32.xlu0 %v2171_v45 }
0x13f7   :  { %2195 = vrot.lane.b32.xlu1 %v3700_v8, %s3949_s3 }
0x13fb   :  { %2282 = vrot.lane.b32.xlu1 %v3780_v7, %s3950_s19  ;;  %v2786_v7 = vld [vmem:[%s3929_s4 + $0x20] sm:$0xff] }
0x13ff   :  { %2284 = vrot.lane.b32.xlu1 %v3778_v6, %s3950_s19  ;;  %v2787_v6 = vld [vmem:[%s3929_s4 + $0x28] sm:$0xff] }
0x1403   :  { %2292 = vrot.lane.b32.xlu1 %v3102_v38, %s3951_s20  ;;  %v2800_v38 = vld [vmem:[%s3933_s8 + $0x30] sm:$0xff] }
0x146f   :  { %v2176_v11 = vpop.xlane.xlu1 %2175 }
0x1470   :  { %v2178_v46 = vsub.f32 %v2168_v41, %v2176_v11  ;;  %v2813_v41 = vld [vmem:[%s3935_s10 + $0x78] sm:$0xff] }
0x1471   :  { %v2173_v47 = vpop.xlane.xlu0 %2172 }
0x1472   :  { %v2181_v48 = vmul.f32 1.442695, %v2178_v46  ;;  %v2177_v5 = vsub.f32 %v2163_v43, %v2173_v47  ;;  %v2811_v43 = vld [vmem:[%s3935_s10 + $0x68] sm:$0xff] }
0x1473   :  { %v2196_v2 = vpop.permute.xlu1 %2195 }
0x1474   :  { %3240 = vpow2.f32 %v2181_v48  ;;  %v2179_v49 = vmul.f32 1.442695, %v2177_v5  ;;  %3110 = vmatprep.subr.mxu0 %v2196_v2 }
0x1475   :  { %3111 = vmatpush3.msra.mxu0 %v2196_v2 }
0x1476   :  { %3242 = vpow2.f32 %v2179_v49  ;;  %v2796_v49 = vld [vmem:[%s3931_s6 + $0x1] ss:$0 sm:$0xff] }
0x1477   :  { %v2283_v10 = vpop.permute.xlu1 %2282 }
0x1478   :  { %v2304_v20 = vsel %vm181_vm1, %v3776_v4, %v2283_v10  ;;  %v2791_v4 = vld [vmem:[%s3930_s5 + $0x1] ss:$0 sm:$0xff] }
0x147b   :  { %v2285_v14 = vpop.permute.xlu1 %2284 }
0x147c   :  { %v2305_v23 = vsel %vm181_vm1, %v3774_v3, %v2285_v14 }
0x147f   :  { %v2293_v17 = vpop.permute.xlu1 %2292 }
0x1480   :  { %v2307_v26 = vsel %vm267_vm2, %v2305_v23, %v2293_v17  ;;  %v2815_v17 = vld [vmem:[%s3936_s11 + $0x1] ss:$0 sm:$0xff] }
0x1481   :  { %v3241_v8 = vpop.eup %3240 }
0x1482   :  { %v2186_v50 = vsel %vm267_vm2, %v3241_v8, 0.0 }
0x1483   :  { %v3243_v51 = vpop.eup %3242  ;;  %2187 = vadd.xlane.f32.xlu0 %v2186_v50  ;;  %v2797_v50 = vld [vmem:[%s3932_s7 + $0x1] ss:$0 sm:$0xff] }
0x1484   :  { %v2183_v52 = vsel %vm267_vm2, %v3243_v51, 0.0 }
0x1487   :  { %2184 = vadd.xlane.f32.xlu0 %v2183_v52 }
0x149d   :  { %2193 = vrot.lane.b32.xlu0 %v3702_v63, %s3949_s3  ;;  %v2789_v63 = vld [vmem:[%s3929_s4 + $0x38] sm:$0xff] }
0x14a1   :  { %2290 = vrot.lane.b32.xlu0 %v2071_v39, %s3951_s20  ;;  %v2799_v39 = vld [vmem:[%s3933_s8 + $0x28] sm:$0xff]  ;;  %s3341_s20 = smov [#allocation7]  }
0x14a2   :  { %s2701_s21 = sshll.u32 %s3341_s20, 4  ;;  %s2702_s21 = int_to_ptr.vmem [resolvable:$true] %s2701_s21 }
0x14a3   :  { %s3298_s22 = scalar_lea.vmem %s2702_s21, 256  ;;  %p3303_p11 = scmp.lt.s32.totalorder %s2702_s21, %s2702_s21 }
0x14a4   :  { %p3299_p10 = scmp.ne.s32.totalorder %s2702_s21, %s3298_s22  ;;  %p3304_p12 = scmp.lt.s32.totalorder %s3298_s22, %s3298_s22 }
0x14a6   :  { %p3305_p13 = por %p3304_p12, %p3303_p11 }
0x14a8   :  { %p3306_p0 = pnand %p3305_p13, %p3299_p10 }
0x150c   :  { %v2188_v53 = vpop.xlane.xlu0 %2187 }
0x150d   :  { %3244 = vrcp.f32 %v2188_v53 }
0x1510   :  { %v2185_v54 = vpop.xlane.xlu0 %2184 }
0x1511   :  { %3246 = vrcp.f32 %v2185_v54 }
0x1514   :  { %v2194_v55 = vpop.permute.xlu0 %2193 }
0x1515   :  { %3112 = vmatprep.subr.mxu0 %v2194_v55 }
0x1516   :  { %3113 = vmatpush3.msra.mxu0 %v2194_v55 }
0x1517   :  { %3117 = vmatprep.subr.mxu0 %v2789_v63 }
0x1518   :  { %v2291_v18 = vpop.permute.xlu0 %2290 }
0x1519   :  { %v2306_v24 = vsel %vm267_vm2, %v2304_v20, %v2291_v18 }
0x151a   :  { %v3245_v56 = vpop.eup %3244 }
0x151b   :  { %v2192_v61 = vmul.f32 %v3245_v56, %v3241_v8 }
0x151e   :  { %v3247_v57 = vpop.eup %3246 }
0x151f   :  { %v2190_v60 = vmul.f32 %v3247_v57, %v3243_v51  ;;  %v2809_v57 = vld [vmem:[%s3935_s10 + $0x58] sm:$0xff] }
0x1521   :  { %3114 = vmatprep.mubr.msk.f32.mxu0 %vm267_vm2, %v2190_v60  ;;  %v2808_v60 = vld [vmem:[%s3935_s10 + $0x50] sm:$0xff] }
0x1522   :  { %3115 = vmatmul.mubr.msk.f32.vlgmr.msra.gmra.mxu0 %vm267_vm2, %v2192_v61  ;;  %v2807_v61 = vld [vmem:[%s3935_s10 + $0x48] sm:$0xff] }
0x1523   :  { %3118 = vmatpush3.msra.mxu0 %v2789_v63  ;;  %v2806_v63 = vld [vmem:[%s3935_s10 + $0x40] sm:$0xff] }
0x1524   :  { %3119 = vmatprep.subr.mxu0 %v2788_v62 }
0x1525   :  { %3120 = vmatpush3.msra.mxu0 %v2788_v62  ;;  %v2803_v62 = vld [vmem:[%s3934_s9 + $0x1] ss:$0 sm:$0xff] }
0x1526   :  { %3121 = vmatprep.subr.mxu0 %v2787_v6 }
0x1527   :  { %3122 = vmatpush3.msra.mxu0 %v2787_v6 }
0x1528   :  { %3123 = vmatprep.subr.mxu0 %v2786_v7 }
0x1529   :  { %3124 = vmatpush3.msra.mxu0 %v2786_v7 }
0x152a   :  { %3139 = vmatprep.subr.mxu0 %v2813_v41 }
0x15e2   :  { %v3116_v9 = vpop.f32.mrf.mxu0 }
0x15e3   :  { %2300 = vrot.lane.b32.xlu1 %v3116_v9, %s3952_s16 }
0x15e4   :  { %v2271_v13 = vpop.f32.mrf.mxu0 }
0x15e5   :  { %2298 = vrot.lane.b32.xlu0 %v2271_v13, %s3952_s16 }
0x1655   :  { %v2301_v22 = vpop.permute.xlu1 %2300 }
0x1656   :  { %v2309_v28 = vsel %vm1005_vm3, %v2307_v26, %v2301_v22 }
0x1657   :  { %v2299_v25 = vpop.permute.xlu0 %2298 }
0x1658   :  { %v2308_v27 = vsel %vm1005_vm3, %v2306_v24, %v2299_v25 }
0x1659   :  { %3125 = vmatprep.mubr.msk.f32.mxu0 %vm91_vm0, %v2308_v27 }
0x165a   :  { %3126 = vmatmul.mubr.msk.f32.vlgmr.msra.gmra.mxu0 %vm91_vm0, %v2309_v28 }
0x165b   :  { %3140 = vmatpush3.msra.mxu0 %v2813_v41 }
0x165c   :  { %3141 = vmatprep.subr.mxu0 %v2812_v42 }
0x165d   :  { %3142 = vmatpush3.msra.mxu0 %v2812_v42 }
0x165e   :  { %3143 = vmatprep.subr.mxu0 %v2811_v43 }
0x165f   :  { %3144 = vmatpush3.msra.mxu0 %v2811_v43 }
0x1660   :  { %3145 = vmatprep.subr.mxu0 %v2810_v44 }
0x1661   :  { %3146 = vmatpush3.msra.mxu0 %v2810_v44 }
0x1662   :  { %3147 = vmatprep.subr.mxu0 %v2809_v57 }
0x1663   :  { %3148 = vmatpush3.msra.mxu0 %v2809_v57 }
0x1664   :  { %3149 = vmatprep.subr.mxu0 %v2808_v60 }
0x1665   :  { %3150 = vmatpush3.msra.mxu0 %v2808_v60 }
0x1666   :  { %3151 = vmatprep.subr.mxu0 %v2807_v61 }
0x1667   :  { %3152 = vmatpush3.msra.mxu0 %v2807_v61 }
0x1668   :  { %3153 = vmatprep.subr.mxu0 %v2806_v63 }
0x1669   :  { %3154 = vmatpush3.msra.mxu0 %v2806_v63 }
0x171a   :  { %v3127_v21 = vpop.f32.mrf.mxu0 }
0x171b   :  { %v2401_v19 = vadd.f32 %v3127_v21, %v2791_v4 }
0x171c   :  { %v2395_v3 = vpop.f32.mrf.mxu0 }
0x171d   :  { %v2396_v29 = vadd.f32 %v2791_v4, %v2395_v3  ;;  %v2405_v30 = vadd.f32 %v2401_v19, %v3691_v59 }
0x171f   :  { %v2413_v31 = vsel %vm91_vm0, %v2405_v30, 0.0  ;;  %v2404_v1 = vadd.f32 %v2396_v29, %v3689_v58  ;;  %v2801_v58 = vld [vmem:[%s3933_s8 + $0x38] sm:$0xff] }
0x1720   :  { %2414 = vadd.xlane.f32.xlu1 %v2413_v31  ;;  %3128 = vmatprep.subr.mxu1 %v2801_v58 }
0x1721   :  { %v2410_v32 = vsel %vm91_vm0, %v2404_v1, 0.0  ;;  %3129 = vmatpush3.msra.mxu1 %v2801_v58  ;;  %v2821_v58 = vld [vmem:[%s3938_s13 + $0x1] ss:$0 sm:$0xff] }
0x1722   :  { %2411 = vadd.xlane.f32.xlu0 %v2410_v32  ;;  %3130 = vmatprep.subr.mxu1 %v2800_v38 }
0x1723   :  { %3131 = vmatpush3.msra.mxu1 %v2800_v38 }
0x1724   :  { %3132 = vmatprep.subr.mxu1 %v2799_v39 }
0x1725   :  { %3133 = vmatpush3.msra.mxu1 %v2799_v39 }
0x1726   :  { %3134 = vmatprep.subr.mxu1 %v2798_v40 }
0x1727   :  { %3135 = vmatpush3.msra.mxu1 %v2798_v40 }
0x17a9   :  { %v2415_v33 = vpop.xlane.xlu1 %2414 }
0x17aa   :  { %v2417_v34 = vmul.f32 0.03125, %v2415_v33 }
0x17ab   :  { %v2412_v16 = vpop.xlane.xlu0 %2411 }
0x17ac   :  { %v2416_v35 = vmul.f32 0.03125, %v2412_v16  ;;  %v2419_v36 = vsub.f32 %v2405_v30, %v2417_v34 }
0x17ae   :  { %v2418_v15 = vsub.f32 %v2404_v1, %v2416_v35  ;;  %v2421_v12 = vmul.f32 %v2419_v36, %v2419_v36 }
0x17b0   :  { %v2420_v37 = vmul.f32 %v2418_v15, %v2418_v15  ;;  %v2425_v59 = vsel %vm91_vm0, %v2421_v12, 0.0 }
0x17b2   :  { %v2422_v0 = vsel %vm91_vm0, %v2420_v37, 0.0 }
0x17b3   :  { %2423 = vadd.xlane.f32.xlu0 %v2422_v0  ;;  %v2820_v0 = vld [vmem:[%s3937_s12 + $0x1] ss:$0 sm:$0xff] }
0x17b7   :  { %2426 = vadd.xlane.f32.xlu0 %v2425_v59 }
0x183c   :  { %v2424_v45 = vpop.xlane.xlu0 %2423 }
0x183d   :  { %v2428_v11 = vmul.f32 0.03125, %v2424_v45 }
0x183f   :  { %v2430_v46 = vadd.f32 1e-05, %v2428_v11 }
0x1840   :  { %v2427_v47 = vpop.xlane.xlu0 %2426 }
0x1841   :  { %3248 = vrsqrt.f32 %v2430_v46  ;;  %v2429_v48 = vmul.f32 0.03125, %v2427_v47 }
0x1843   :  { %v2431_v5 = vadd.f32 1e-05, %v2429_v48 }
0x1845   :  { %3250 = vrsqrt.f32 %v2431_v5 }
0x184e   :  { %v3249_v2 = vpop.eup %3248 }
0x184f   :  { %v2434_v8 = vmul.f32 %v3249_v2, %v2418_v15 }
0x1851   :  { %v2442_v51 = vmul.f32 %v2796_v49, %v2434_v8 }
0x1852   :  { %v3251_v52 = vpop.eup %3250 }
0x1853   :  { %v2435_v53 = vmul.f32 %v3251_v52, %v2419_v36  ;;  %v2450_v54 = vadd.f32 %v2797_v50, %v2442_v51 }
0x1855   :  { %v2443_v55 = vmul.f32 %v2796_v49, %v2435_v53  ;;  %3136 = vmatprep.mubr.msk.f32.mxu1 %vm91_vm0, %v2450_v54 }
0x1857   :  { %v2451_v56 = vadd.f32 %v2797_v50, %v2443_v55 }
0x1859   :  { %3137 = vmatmul.mubr.msk.f32.vlgmr.msra.gmra.mxu1 %vm91_vm0, %v2451_v56 }
0x1919   :  { %v3138_v6 = vpop.f32.mrf.mxu1 }
0x191a   :  { %v2543_v7 = vadd.f32 %v3138_v6, %v2803_v62 }
0x191b   :  { %v2537_v9 = vpop.f32.mrf.mxu1 }
0x191c   :  { %v2538_v13 = vadd.f32 %v2803_v62, %v2537_v9  ;;  %v2547_v14 = vmax.f32 %v2543_v7, 0.0 }
0x191e   :  { %v2546_v10 = vmax.f32 %v2538_v13, 0.0 }
0x1920   :  { %3155 = vmatprep.mubr.msk.f32.mxu0 %vm1256_vm4, %v2546_v10 }
0x1921   :  { %3156 = vmatmul.mubr.msk.f32.vlgmr.msra.gmra.mxu0 %vm1256_vm4, %v2547_v14 }
0x19e1   :  { %v3157_v18 = vpop.f32.mrf.mxu0 }
0x19e2   :  { %v2643_v20 = vadd.f32 %v3157_v18, %v2815_v17 }
0x19e3   :  { %v2637_v22 = vpop.f32.mrf.mxu0 }
0x19e4   :  { %v2647_v23 = vadd.f32 %v2643_v20, %v2451_v56  ;;  %v2638_v24 = vadd.f32 %v2815_v17, %v2637_v22 }
0x19e6   :  { %v2646_v25 = vadd.f32 %v2638_v24, %v2450_v54  ;;  %v2655_v26 = vsel %vm91_vm0, %v2647_v23, 0.0 }
0x19e7   :  { %2656 = vadd.xlane.f32.xlu0 %v2655_v26 }
0x19e8   :  { %v2652_v27 = vsel %vm91_vm0, %v2646_v25, 0.0 }
0x19e9   :  { %2653 = vadd.xlane.f32.xlu1 %v2652_v27 }
0x1a70   :  { %v2657_v28 = vpop.xlane.xlu0 %2656 }
0x1a71   :  { %v2659_v4 = vmul.f32 0.03125, %v2657_v28 }
0x1a72   :  { %v2654_v21 = vpop.xlane.xlu1 %2653 }
0x1a73   :  { %v2661_v19 = vsub.f32 %v2647_v23, %v2659_v4  ;;  %v2658_v3 = vmul.f32 0.03125, %v2654_v21 }
0x1a75   :  { %v2660_v29 = vsub.f32 %v2646_v25, %v2658_v3  ;;  %v2663_v30 = vmul.f32 %v2661_v19, %v2661_v19 }
0x1a77   :  { %v2667_v31 = vsel %vm91_vm0, %v2663_v30, 0.0  ;;  %v2662_v1 = vmul.f32 %v2660_v29, %v2660_v29 }
0x1a78   :  { %2668 = vadd.xlane.f32.xlu0 %v2667_v31 }
0x1a79   :  { %v2664_v32 = vsel %vm91_vm0, %v2662_v1, 0.0 }
0x1a7a   :  { %2665 = vadd.xlane.f32.xlu1 %v2664_v32 }
0x1b01   :  { %v2669_v33 = vpop.xlane.xlu0 %2668 }
0x1b02   :  { %v2671_v34 = vmul.f32 0.03125, %v2669_v33 }
0x1b03   :  { %v2666_v16 = vpop.xlane.xlu1 %2665 }
0x1b04   :  { %v2673_v35 = vadd.f32 1e-05, %v2671_v34  ;;  %v2670_v36 = vmul.f32 0.03125, %v2666_v16 }
0x1b06   :  { %3252 = vrsqrt.f32 %v2673_v35  ;;  %v2672_v15 = vadd.f32 1e-05, %v2670_v36 }
0x1b08   :  { %3254 = vrsqrt.f32 %v2672_v15 }
0x1b13   :  { %v3253_v37 = vpop.eup %3252 }
0x1b14   :  { %v2677_v12 = vmul.f32 %v3253_v37, %v2661_v19 }
0x1b15   :  { %v3255_v59 = vpop.eup %3254 }
0x1b16   :  { %v2676_v38 = vmul.f32 %v3255_v59, %v2660_v29  ;;  %v2685_v39 = vmul.f32 %v2820_v0, %v2677_v12 }
0x1b18   :  { %v2684_v40 = vmul.f32 %v2820_v0, %v2676_v38  ;;  %v2693_v41 = vadd.f32 %v2821_v58, %v2685_v39 }
0x1b1a   :  { %v2692_v42 = vadd.f32 %v2821_v58, %v2684_v40  ;;  %2695 = vst.msk [vmem:[#allocation7 + $0x8] sm:$0xff] %vm91_vm0, %v2693_v41 }
0x1b1c   :  { %2694 = vst.msk [vmem:[#allocation7] sm:$0xff] %vm91_vm0, %v2692_v42 }
0x1b1d   :  { %3309 = shalt.err (!%p3306_p0)
}
0x1b1e   :  { %s3953_s12 = smov 128  }
0x1b1f   :  { %2707 = dma.vmem_to_hbm [thread:$0]  %s2702_s21, 256, %s3939_s14, [#allocation4], %s3953_s12, %s3953_s12, %s3950_s19  }
0x1b20   :  { %3322 = dma.done.wait [#allocation4], 256  }
0x1b21   :  { %3323 = vsyncadd [#allocation4], 4294967040 }
0x1b22   :  { %2711 = vsyncpa [#allocation3], 1 }
0x1b23   :  { %2712 = vsyncpa [#allocation6], 1 }
0x1b24   :  { %2713 = vsyncpa [#allocation4], 1 }

</bundles_post_ra>
